<compile_context>
chip_gen: v6e
topology: v6e:2x2x1
jax: 0.10.0
libtpu: 0.0.40
codegen_flags: <defaults>
</compile_context>

<pallas_src>
import functools
import math

import jax
import jax.numpy as jnp
from jax.experimental import pallas as pl
from jax.experimental.pallas import tpu as pltpu

# Keep f32-exact matmuls so the kernel matches the f32 reference closely at
# this toy size. (At production scale, switch activations/weights to bf16 with
# f32 accumulation instead, per the perf review.)
jax.config.update("jax_default_matmul_precision", "highest")


def _layernorm(x, g, b, eps=1e-5):
    mu = jnp.mean(x, axis=-1, keepdims=True)
    xc = x - mu
    var = jnp.mean(xc * xc, axis=-1, keepdims=True)
    return xc * jax.lax.rsqrt(var + eps) * g + b


# ---------------------------------------------------------------------------
# Kernel: one block holds `block_b` batch elements flattened to (block_b*T, D)
# ---------------------------------------------------------------------------
def mhsa_kernel(x_ref, g_ref, b_ref, wqkv_ref, out_ref, *,
                num_heads, seq_len, block_b):
    x = x_ref[...]                                  # (block_b*T, D)
    D = x.shape[-1]
    T = seq_len
    H = num_heads
    hd = D // H
    inv_sqrt = 1.0 / math.sqrt(hd)                  # torch: / sqrt(D // H)

    # LayerNorm once, then one fused QKV matmul with M = block_b*T rows.
    xn = _layernorm(x, g_ref[...], b_ref[...])
    qkv = jnp.dot(xn, wqkv_ref[...],
                  preferred_element_type=jnp.float32)   # (block_b*T, 3D)

    # Per (batch, head) attention on (T, T) scores; results written straight
    # into the output ref slices (residual fused in).
    for bi in range(block_b):                       # static unroll (small)
        r0 = bi * T
        for h in range(H):                          # static unroll (small)
            c0 = h * hd
            qh = qkv[r0:r0 + T, c0:c0 + hd]
            kh = qkv[r0:r0 + T, D + c0:D + c0 + hd]
            vh = qkv[r0:r0 + T, 2 * D + c0:2 * D + c0 + hd]

            s = jax.lax.dot_general(
                qh, kh, (((1,), (1,)), ((), ())),
                preferred_element_type=jnp.float32) * inv_sqrt   # (T, T)
            s = s - jnp.max(s, axis=-1, keepdims=True)
            p = jnp.exp(s)
            p = p * pl.reciprocal(jnp.sum(p, axis=-1, keepdims=True),
                                  approx=True)
            pv = jnp.dot(p, vh, preferred_element_type=jnp.float32)  # (T, hd)

            out_ref[r0:r0 + T, c0:c0 + hd] = x[r0:r0 + T, c0:c0 + hd] + pv


# ---------------------------------------------------------------------------
# Wrapper
# ---------------------------------------------------------------------------
def temporal_mhsa(x, ln_g, ln_b, wq, wk, wv, *, num_heads, block_b=None):
    """x: (B, T, D); wq/wk/wv in torch nn.Linear layout (out, in); ln_*: (D,)."""
    B, T, D = x.shape
    if block_b is None:
        block_b = B
    assert B % block_b == 0, "block_b must divide B"
    assert D % num_heads == 0, "latent_dim must be divisible by num_heads"

    # torch Linear computes x @ W.T; pre-transpose and fuse Q|K|V -> (D, 3D).
    wqkv = jnp.concatenate([wq.T, wk.T, wv.T], axis=1)
    x2 = x.reshape(B * T, D)                     # metadata-only reshape
    g2 = ln_g.reshape(1, D)
    b2 = ln_b.reshape(1, D)

    rows = block_b * T
    kernel = functools.partial(mhsa_kernel, num_heads=num_heads,
                               seq_len=T, block_b=block_b)
    out = pl.pallas_call(
        kernel,
        out_shape=jax.ShapeDtypeStruct((B * T, D), jnp.float32),
        grid=(B // block_b,),
        in_specs=[
            pl.BlockSpec((rows, D), lambda i: (i, 0)),
            pl.BlockSpec((1, D), lambda i: (0, 0)),
            pl.BlockSpec((1, D), lambda i: (0, 0)),
            pl.BlockSpec((D, 3 * D), lambda i: (0, 0)),
        ],
        out_specs=pl.BlockSpec((rows, D), lambda i: (i, 0)),
        compiler_params=pltpu.CompilerParams(
            dimension_semantics=("parallel",)),   # batch-chunk axis -> 2 TCs on v7x
    )(x2, g2, b2, wqkv)
    return out.reshape(B, T, D)


# ---------------------------------------------------------------------------
# Pure-JAX reference (mirrors the PyTorch forward exactly)
# ---------------------------------------------------------------------------
def temporal_mhsa_reference(x, ln_g, ln_b, wq, wk, wv, *, num_heads):
    B, T, D = x.shape
    H = num_heads
    hd = D // H
    mu = x.mean(-1, keepdims=True)
    var = ((x - mu) ** 2).mean(-1, keepdims=True)
    xn = (x - mu) / jnp.sqrt(var + 1e-5) * ln_g + ln_b
    q = (xn @ wq.T).reshape(B, T, H, hd)
    k = (xn @ wk.T).reshape(B, T, H, hd)
    v = (xn @ wv.T).reshape(B, T, H, hd)
    att = jnp.einsum("bnhd,bmhd->bnmh", q, k) / math.sqrt(D // H)
    w = jax.nn.softmax(att, axis=2)
    y = jnp.einsum("bnmh,bmhd->bnhd", w, v).reshape(B, T, D)
    return x + y


# ---------------------------------------------------------------------------
if __name__ == "__main__":
    B, T, D, H = 2, 8, 32, 4

    key = jax.random.PRNGKey(0)
    kx, kq, kk, kv, kg, kb = jax.random.split(key, 6)
    x = jax.random.normal(kx, (B, T, D), jnp.float32)
    scale = 1.0 / math.sqrt(D)
    wq = jax.random.normal(kq, (D, D), jnp.float32) * scale   # (out, in) layout
    wk = jax.random.normal(kk, (D, D), jnp.float32) * scale
    wv = jax.random.normal(kv, (D, D), jnp.float32) * scale
    ln_g = 1.0 + 0.1 * jax.random.normal(kg, (D,), jnp.float32)
    ln_b = 0.1 * jax.random.normal(kb, (D,), jnp.float32)

    out = temporal_mhsa(x, ln_g, ln_b, wq, wk, wv, num_heads=H)
    out = jax.block_until_ready(out)
    assert out.shape == (B, T, D)

    ref = temporal_mhsa_reference(x, ln_g, ln_b, wq, wk, wv, num_heads=H)
    err = float(jnp.max(jnp.abs(out - ref)))
    assert err < 1e-2, f"max abs err {err}"

    print("KERNEL_OK")
</pallas_src>

<mosaic_0001>
module attributes {stable_mosaic.version = 11 : i64} {
  func.func @mhsa_kernel(%arg0: i32, %arg1: memref<16x32xf32, #tpu.memory_space<vmem>>, %arg2: memref<1x32xf32, #tpu.memory_space<vmem>>, %arg3: memref<1x32xf32, #tpu.memory_space<vmem>>, %arg4: memref<32x96xf32, #tpu.memory_space<vmem>>, %arg5: memref<16x32xf32, #tpu.memory_space<vmem>>) attributes {dimension_semantics = [#tpu.dimension_semantics<parallel>], iteration_bounds = array<i64: 1>, scalar_prefetch = 0 : i64, scratch_operands = 0 : i64, tpu.core_type = #tpu.core_type<tc>, window_params = [{transform_indices = @transform_0, window_bounds = array<i64: 16, 32>}, {pipeline_mode = #tpu.pipeline_mode<synchronous>, transform_indices = @transform_1, window_bounds = array<i64: 1, 32>}, {pipeline_mode = #tpu.pipeline_mode<synchronous>, transform_indices = @transform_2, window_bounds = array<i64: 1, 32>}, {pipeline_mode = #tpu.pipeline_mode<synchronous>, transform_indices = @transform_3, window_bounds = array<i64: 32, 96>}, {transform_indices = @transform_4, window_bounds = array<i64: 16, 32>}]} {
    %c0 = arith.constant 0 : index
    %c0_0 = arith.constant 0 : index
    %0 = vector.load %arg1[%c0, %c0_0] : memref<16x32xf32, #tpu.memory_space<vmem>>, vector<16x32xf32>
    %c0_1 = arith.constant 0 : index
    %c0_2 = arith.constant 0 : index
    %1 = vector.load %arg2[%c0_1, %c0_2] : memref<1x32xf32, #tpu.memory_space<vmem>>, vector<1x32xf32>
    %c0_3 = arith.constant 0 : index
    %c0_4 = arith.constant 0 : index
    %2 = vector.load %arg3[%c0_3, %c0_4] : memref<1x32xf32, #tpu.memory_space<vmem>>, vector<1x32xf32>
    %cst = arith.constant dense<0.000000e+00> : vector<16xf32>
    %3 = vector.multi_reduction <add>, %0, %cst [1] : vector<16x32xf32> to vector<16xf32>
    %4 = vector.shape_cast %3 : vector<16xf32> to vector<16x1xf32>
    %cst_5 = arith.constant 3.200000e+01 : f32
    %5 = vector.broadcast %cst_5 : f32 to vector<16x1xf32>
    %6 = arith.divf %4, %5 : vector<16x1xf32>
    %7 = vector.broadcast %6 : vector<16x1xf32> to vector<16x32xf32>
    %8 = arith.subf %0, %7 : vector<16x32xf32>
    %9 = arith.mulf %8, %8 : vector<16x32xf32>
    %cst_6 = arith.constant dense<0.000000e+00> : vector<16xf32>
    %10 = vector.multi_reduction <add>, %9, %cst_6 [1] : vector<16x32xf32> to vector<16xf32>
    %11 = vector.shape_cast %10 : vector<16xf32> to vector<16x1xf32>
    %cst_7 = arith.constant 3.200000e+01 : f32
    %12 = vector.broadcast %cst_7 : f32 to vector<16x1xf32>
    %13 = arith.divf %11, %12 : vector<16x1xf32>
    %cst_8 = arith.constant 9.99999974E-6 : f32
    %14 = vector.broadcast %cst_8 : f32 to vector<16x1xf32>
    %15 = arith.addf %13, %14 : vector<16x1xf32>
    %16 = math.rsqrt %15 : vector<16x1xf32>
    %17 = vector.broadcast %16 : vector<16x1xf32> to vector<16x32xf32>
    %18 = arith.mulf %8, %17 : vector<16x32xf32>
    %19 = vector.broadcast %1 : vector<1x32xf32> to vector<16x32xf32>
    %20 = arith.mulf %18, %19 : vector<16x32xf32>
    %21 = vector.broadcast %2 : vector<1x32xf32> to vector<16x32xf32>
    %22 = arith.addf %20, %21 : vector<16x32xf32>
    %c0_9 = arith.constant 0 : index
    %c0_10 = arith.constant 0 : index
    %23 = vector.load %arg4[%c0_9, %c0_10] : memref<32x96xf32, #tpu.memory_space<vmem>>, vector<32x96xf32>
    %cst_11 = arith.constant dense<0.000000e+00> : vector<16x96xf32>
    %24 = tpu.matmul %22, %23, %cst_11 {dimension_numbers = #tpu.dot_dimension_numbers<[1], [0], [0], [1], [0, 0, 1, 1], [], []>, precision = #tpu.contract_precision<fp32>} : vector<16x32xf32>, vector<32x96xf32>, vector<16x96xf32> -> vector<16x96xf32>
    %25 = vector.extract_strided_slice %24 {offsets = [0, 0], sizes = [8, 8], strides = [1, 1]} : vector<16x96xf32> to vector<8x8xf32>
    %26 = vector.extract_strided_slice %24 {offsets = [0, 32], sizes = [8, 8], strides = [1, 1]} : vector<16x96xf32> to vector<8x8xf32>
    %27 = vector.extract_strided_slice %24 {offsets = [0, 64], sizes = [8, 8], strides = [1, 1]} : vector<16x96xf32> to vector<8x8xf32>
    %cst_12 = arith.constant dense<0.000000e+00> : vector<8x8xf32>
    %28 = tpu.matmul %25, %26, %cst_12 {dimension_numbers = #tpu.dot_dimension_numbers<[1], [1], [0], [0], [0, 0, 1, 0], [], []>, precision = #tpu.contract_precision<fp32>} : vector<8x8xf32>, vector<8x8xf32>, vector<8x8xf32> -> vector<8x8xf32>
    %cst_13 = arith.constant 0.353553385 : f32
    %29 = vector.broadcast %cst_13 : f32 to vector<8x8xf32>
    %30 = arith.mulf %28, %29 : vector<8x8xf32>
    %cst_14 = arith.constant dense<0xFF800000> : vector<8xf32>
    %31 = vector.multi_reduction <maximumf>, %30, %cst_14 [1] : vector<8x8xf32> to vector<8xf32>
    %32 = vector.shape_cast %31 : vector<8xf32> to vector<8x1xf32>
    %33 = vector.broadcast %32 : vector<8x1xf32> to vector<8x8xf32>
    %34 = arith.subf %30, %33 : vector<8x8xf32>
    %35 = math.exp %34 : vector<8x8xf32>
    %cst_15 = arith.constant dense<0.000000e+00> : vector<8xf32>
    %36 = vector.multi_reduction <add>, %35, %cst_15 [1] : vector<8x8xf32> to vector<8xf32>
    %37 = vector.shape_cast %36 : vector<8xf32> to vector<8x1xf32>
    %38 = tpu.reciprocal %37 {approx = true} : vector<8x1xf32> -> vector<8x1xf32>
    %39 = vector.broadcast %38 : vector<8x1xf32> to vector<8x8xf32>
    %40 = arith.mulf %35, %39 : vector<8x8xf32>
    %cst_16 = arith.constant dense<0.000000e+00> : vector<8x8xf32>
    %41 = tpu.matmul %40, %27, %cst_16 {dimension_numbers = #tpu.dot_dimension_numbers<[1], [0], [0], [1], [0, 0, 1, 1], [], []>, precision = #tpu.contract_precision<fp32>} : vector<8x8xf32>, vector<8x8xf32>, vector<8x8xf32> -> vector<8x8xf32>
    %42 = vector.extract_strided_slice %0 {offsets = [0, 0], sizes = [8, 8], strides = [1, 1]} : vector<16x32xf32> to vector<8x8xf32>
    %43 = arith.addf %42, %41 : vector<8x8xf32>
    %c0_17 = arith.constant 0 : index
    %c0_18 = arith.constant 0 : index
    %44 = vector.load %arg5[%c0_17, %c0_18] : memref<16x32xf32, #tpu.memory_space<vmem>>, vector<8x8xf32>
    tpu.vector_store %arg5[%c0_17, %c0_18], %43 {strides = array<i32>} : memref<16x32xf32, #tpu.memory_space<vmem>>, vector<8x8xf32>,
    %45 = vector.extract_strided_slice %24 {offsets = [0, 8], sizes = [8, 8], strides = [1, 1]} : vector<16x96xf32> to vector<8x8xf32>
    %46 = vector.extract_strided_slice %24 {offsets = [0, 40], sizes = [8, 8], strides = [1, 1]} : vector<16x96xf32> to vector<8x8xf32>
    %47 = vector.extract_strided_slice %24 {offsets = [0, 72], sizes = [8, 8], strides = [1, 1]} : vector<16x96xf32> to vector<8x8xf32>
    %cst_19 = arith.constant dense<0.000000e+00> : vector<8x8xf32>
    %48 = tpu.matmul %45, %46, %cst_19 {dimension_numbers = #tpu.dot_dimension_numbers<[1], [1], [0], [0], [0, 0, 1, 0], [], []>, precision = #tpu.contract_precision<fp32>} : vector<8x8xf32>, vector<8x8xf32>, vector<8x8xf32> -> vector<8x8xf32>
    %cst_20 = arith.constant 0.353553385 : f32
    %49 = vector.broadcast %cst_20 : f32 to vector<8x8xf32>
    %50 = arith.mulf %48, %49 : vector<8x8xf32>
    %cst_21 = arith.constant dense<0xFF800000> : vector<8xf32>
    %51 = vector.multi_reduction <maximumf>, %50, %cst_21 [1] : vector<8x8xf32> to vector<8xf32>
    %52 = vector.shape_cast %51 : vector<8xf32> to vector<8x1xf32>
    %53 = vector.broadcast %52 : vector<8x1xf32> to vector<8x8xf32>
    %54 = arith.subf %50, %53 : vector<8x8xf32>
    %55 = math.exp %54 : vector<8x8xf32>
    %cst_22 = arith.constant dense<0.000000e+00> : vector<8xf32>
    %56 = vector.multi_reduction <add>, %55, %cst_22 [1] : vector<8x8xf32> to vector<8xf32>
    %57 = vector.shape_cast %56 : vector<8xf32> to vector<8x1xf32>
    %58 = tpu.reciprocal %57 {approx = true} : vector<8x1xf32> -> vector<8x1xf32>
    %59 = vector.broadcast %58 : vector<8x1xf32> to vector<8x8xf32>
    %60 = arith.mulf %55, %59 : vector<8x8xf32>
    %cst_23 = arith.constant dense<0.000000e+00> : vector<8x8xf32>
    %61 = tpu.matmul %60, %47, %cst_23 {dimension_numbers = #tpu.dot_dimension_numbers<[1], [0], [0], [1], [0, 0, 1, 1], [], []>, precision = #tpu.contract_precision<fp32>} : vector<8x8xf32>, vector<8x8xf32>, vector<8x8xf32> -> vector<8x8xf32>
    %62 = vector.extract_strided_slice %0 {offsets = [0, 8], sizes = [8, 8], strides = [1, 1]} : vector<16x32xf32> to vector<8x8xf32>
    %63 = arith.addf %62, %61 : vector<8x8xf32>
    %c0_24 = arith.constant 0 : index
    %c8 = arith.constant 8 : index
    %64 = vector.load %arg5[%c0_24, %c8] : memref<16x32xf32, #tpu.memory_space<vmem>>, vector<8x8xf32>
    tpu.vector_store %arg5[%c0_24, %c8], %63 {strides = array<i32>} : memref<16x32xf32, #tpu.memory_space<vmem>>, vector<8x8xf32>,
    %65 = vector.extract_strided_slice %24 {offsets = [0, 16], sizes = [8, 8], strides = [1, 1]} : vector<16x96xf32> to vector<8x8xf32>
    %66 = vector.extract_strided_slice %24 {offsets = [0, 48], sizes = [8, 8], strides = [1, 1]} : vector<16x96xf32> to vector<8x8xf32>
    %67 = vector.extract_strided_slice %24 {offsets = [0, 80], sizes = [8, 8], strides = [1, 1]} : vector<16x96xf32> to vector<8x8xf32>
    %cst_25 = arith.constant dense<0.000000e+00> : vector<8x8xf32>
    %68 = tpu.matmul %65, %66, %cst_25 {dimension_numbers = #tpu.dot_dimension_numbers<[1], [1], [0], [0], [0, 0, 1, 0], [], []>, precision = #tpu.contract_precision<fp32>} : vector<8x8xf32>, vector<8x8xf32>, vector<8x8xf32> -> vector<8x8xf32>
    %cst_26 = arith.constant 0.353553385 : f32
    %69 = vector.broadcast %cst_26 : f32 to vector<8x8xf32>
    %70 = arith.mulf %68, %69 : vector<8x8xf32>
    %cst_27 = arith.constant dense<0xFF800000> : vector<8xf32>
    %71 = vector.multi_reduction <maximumf>, %70, %cst_27 [1] : vector<8x8xf32> to vector<8xf32>
    %72 = vector.shape_cast %71 : vector<8xf32> to vector<8x1xf32>
    %73 = vector.broadcast %72 : vector<8x1xf32> to vector<8x8xf32>
    %74 = arith.subf %70, %73 : vector<8x8xf32>
    %75 = math.exp %74 : vector<8x8xf32>
    %cst_28 = arith.constant dense<0.000000e+00> : vector<8xf32>
    %76 = vector.multi_reduction <add>, %75, %cst_28 [1] : vector<8x8xf32> to vector<8xf32>
    %77 = vector.shape_cast %76 : vector<8xf32> to vector<8x1xf32>
    %78 = tpu.reciprocal %77 {approx = true} : vector<8x1xf32> -> vector<8x1xf32>
    %79 = vector.broadcast %78 : vector<8x1xf32> to vector<8x8xf32>
    %80 = arith.mulf %75, %79 : vector<8x8xf32>
    %cst_29 = arith.constant dense<0.000000e+00> : vector<8x8xf32>
    %81 = tpu.matmul %80, %67, %cst_29 {dimension_numbers = #tpu.dot_dimension_numbers<[1], [0], [0], [1], [0, 0, 1, 1], [], []>, precision = #tpu.contract_precision<fp32>} : vector<8x8xf32>, vector<8x8xf32>, vector<8x8xf32> -> vector<8x8xf32>
    %82 = vector.extract_strided_slice %0 {offsets = [0, 16], sizes = [8, 8], strides = [1, 1]} : vector<16x32xf32> to vector<8x8xf32>
    %83 = arith.addf %82, %81 : vector<8x8xf32>
    %c0_30 = arith.constant 0 : index
    %c16 = arith.constant 16 : index
    %84 = vector.load %arg5[%c0_30, %c16] : memref<16x32xf32, #tpu.memory_space<vmem>>, vector<8x8xf32>
    tpu.vector_store %arg5[%c0_30, %c16], %83 {strides = array<i32>} : memref<16x32xf32, #tpu.memory_space<vmem>>, vector<8x8xf32>,
    %85 = vector.extract_strided_slice %24 {offsets = [0, 24], sizes = [8, 8], strides = [1, 1]} : vector<16x96xf32> to vector<8x8xf32>
    %86 = vector.extract_strided_slice %24 {offsets = [0, 56], sizes = [8, 8], strides = [1, 1]} : vector<16x96xf32> to vector<8x8xf32>
    %87 = vector.extract_strided_slice %24 {offsets = [0, 88], sizes = [8, 8], strides = [1, 1]} : vector<16x96xf32> to vector<8x8xf32>
    %cst_31 = arith.constant dense<0.000000e+00> : vector<8x8xf32>
    %88 = tpu.matmul %85, %86, %cst_31 {dimension_numbers = #tpu.dot_dimension_numbers<[1], [1], [0], [0], [0, 0, 1, 0], [], []>, precision = #tpu.contract_precision<fp32>} : vector<8x8xf32>, vector<8x8xf32>, vector<8x8xf32> -> vector<8x8xf32>
    %cst_32 = arith.constant 0.353553385 : f32
    %89 = vector.broadcast %cst_32 : f32 to vector<8x8xf32>
    %90 = arith.mulf %88, %89 : vector<8x8xf32>
    %cst_33 = arith.constant dense<0xFF800000> : vector<8xf32>
    %91 = vector.multi_reduction <maximumf>, %90, %cst_33 [1] : vector<8x8xf32> to vector<8xf32>
    %92 = vector.shape_cast %91 : vector<8xf32> to vector<8x1xf32>
    %93 = vector.broadcast %92 : vector<8x1xf32> to vector<8x8xf32>
    %94 = arith.subf %90, %93 : vector<8x8xf32>
    %95 = math.exp %94 : vector<8x8xf32>
    %cst_34 = arith.constant dense<0.000000e+00> : vector<8xf32>
    %96 = vector.multi_reduction <add>, %95, %cst_34 [1] : vector<8x8xf32> to vector<8xf32>
    %97 = vector.shape_cast %96 : vector<8xf32> to vector<8x1xf32>
    %98 = tpu.reciprocal %97 {approx = true} : vector<8x1xf32> -> vector<8x1xf32>
    %99 = vector.broadcast %98 : vector<8x1xf32> to vector<8x8xf32>
    %100 = arith.mulf %95, %99 : vector<8x8xf32>
    %cst_35 = arith.constant dense<0.000000e+00> : vector<8x8xf32>
    %101 = tpu.matmul %100, %87, %cst_35 {dimension_numbers = #tpu.dot_dimension_numbers<[1], [0], [0], [1], [0, 0, 1, 1], [], []>, precision = #tpu.contract_precision<fp32>} : vector<8x8xf32>, vector<8x8xf32>, vector<8x8xf32> -> vector<8x8xf32>
    %102 = vector.extract_strided_slice %0 {offsets = [0, 24], sizes = [8, 8], strides = [1, 1]} : vector<16x32xf32> to vector<8x8xf32>
    %103 = arith.addf %102, %101 : vector<8x8xf32>
    %c0_36 = arith.constant 0 : index
    %c24 = arith.constant 24 : index
    %104 = vector.load %arg5[%c0_36, %c24] : memref<16x32xf32, #tpu.memory_space<vmem>>, vector<8x8xf32>
    tpu.vector_store %arg5[%c0_36, %c24], %103 {strides = array<i32>} : memref<16x32xf32, #tpu.memory_space<vmem>>, vector<8x8xf32>,
    %105 = vector.extract_strided_slice %24 {offsets = [8, 0], sizes = [8, 8], strides = [1, 1]} : vector<16x96xf32> to vector<8x8xf32>
    %106 = vector.extract_strided_slice %24 {offsets = [8, 32], sizes = [8, 8], strides = [1, 1]} : vector<16x96xf32> to vector<8x8xf32>
    %107 = vector.extract_strided_slice %24 {offsets = [8, 64], sizes = [8, 8], strides = [1, 1]} : vector<16x96xf32> to vector<8x8xf32>
    %cst_37 = arith.constant dense<0.000000e+00> : vector<8x8xf32>
    %108 = tpu.matmul %105, %106, %cst_37 {dimension_numbers = #tpu.dot_dimension_numbers<[1], [1], [0], [0], [0, 0, 1, 0], [], []>, precision = #tpu.contract_precision<fp32>} : vector<8x8xf32>, vector<8x8xf32>, vector<8x8xf32> -> vector<8x8xf32>
    %cst_38 = arith.constant 0.353553385 : f32
    %109 = vector.broadcast %cst_38 : f32 to vector<8x8xf32>
    %110 = arith.mulf %108, %109 : vector<8x8xf32>
    %cst_39 = arith.constant dense<0xFF800000> : vector<8xf32>
    %111 = vector.multi_reduction <maximumf>, %110, %cst_39 [1] : vector<8x8xf32> to vector<8xf32>
    %112 = vector.shape_cast %111 : vector<8xf32> to vector<8x1xf32>
    %113 = vector.broadcast %112 : vector<8x1xf32> to vector<8x8xf32>
    %114 = arith.subf %110, %113 : vector<8x8xf32>
    %115 = math.exp %114 : vector<8x8xf32>
    %cst_40 = arith.constant dense<0.000000e+00> : vector<8xf32>
    %116 = vector.multi_reduction <add>, %115, %cst_40 [1] : vector<8x8xf32> to vector<8xf32>
    %117 = vector.shape_cast %116 : vector<8xf32> to vector<8x1xf32>
    %118 = tpu.reciprocal %117 {approx = true} : vector<8x1xf32> -> vector<8x1xf32>
    %119 = vector.broadcast %118 : vector<8x1xf32> to vector<8x8xf32>
    %120 = arith.mulf %115, %119 : vector<8x8xf32>
    %cst_41 = arith.constant dense<0.000000e+00> : vector<8x8xf32>
    %121 = tpu.matmul %120, %107, %cst_41 {dimension_numbers = #tpu.dot_dimension_numbers<[1], [0], [0], [1], [0, 0, 1, 1], [], []>, precision = #tpu.contract_precision<fp32>} : vector<8x8xf32>, vector<8x8xf32>, vector<8x8xf32> -> vector<8x8xf32>
    %122 = vector.extract_strided_slice %0 {offsets = [8, 0], sizes = [8, 8], strides = [1, 1]} : vector<16x32xf32> to vector<8x8xf32>
    %123 = arith.addf %122, %121 : vector<8x8xf32>
    %c8_42 = arith.constant 8 : index
    %c0_43 = arith.constant 0 : index
    %124 = vector.load %arg5[%c8_42, %c0_43] : memref<16x32xf32, #tpu.memory_space<vmem>>, vector<8x8xf32>
    tpu.vector_store %arg5[%c8_42, %c0_43], %123 {strides = array<i32>} : memref<16x32xf32, #tpu.memory_space<vmem>>, vector<8x8xf32>,
    %125 = vector.extract_strided_slice %24 {offsets = [8, 8], sizes = [8, 8], strides = [1, 1]} : vector<16x96xf32> to vector<8x8xf32>
    %126 = vector.extract_strided_slice %24 {offsets = [8, 40], sizes = [8, 8], strides = [1, 1]} : vector<16x96xf32> to vector<8x8xf32>
    %127 = vector.extract_strided_slice %24 {offsets = [8, 72], sizes = [8, 8], strides = [1, 1]} : vector<16x96xf32> to vector<8x8xf32>
    %cst_44 = arith.constant dense<0.000000e+00> : vector<8x8xf32>
    %128 = tpu.matmul %125, %126, %cst_44 {dimension_numbers = #tpu.dot_dimension_numbers<[1], [1], [0], [0], [0, 0, 1, 0], [], []>, precision = #tpu.contract_precision<fp32>} : vector<8x8xf32>, vector<8x8xf32>, vector<8x8xf32> -> vector<8x8xf32>
    %cst_45 = arith.constant 0.353553385 : f32
    %129 = vector.broadcast %cst_45 : f32 to vector<8x8xf32>
    %130 = arith.mulf %128, %129 : vector<8x8xf32>
    %cst_46 = arith.constant dense<0xFF800000> : vector<8xf32>
    %131 = vector.multi_reduction <maximumf>, %130, %cst_46 [1] : vector<8x8xf32> to vector<8xf32>
    %132 = vector.shape_cast %131 : vector<8xf32> to vector<8x1xf32>
    %133 = vector.broadcast %132 : vector<8x1xf32> to vector<8x8xf32>
    %134 = arith.subf %130, %133 : vector<8x8xf32>
    %135 = math.exp %134 : vector<8x8xf32>
    %cst_47 = arith.constant dense<0.000000e+00> : vector<8xf32>
    %136 = vector.multi_reduction <add>, %135, %cst_47 [1] : vector<8x8xf32> to vector<8xf32>
    %137 = vector.shape_cast %136 : vector<8xf32> to vector<8x1xf32>
    %138 = tpu.reciprocal %137 {approx = true} : vector<8x1xf32> -> vector<8x1xf32>
    %139 = vector.broadcast %138 : vector<8x1xf32> to vector<8x8xf32>
    %140 = arith.mulf %135, %139 : vector<8x8xf32>
    %cst_48 = arith.constant dense<0.000000e+00> : vector<8x8xf32>
    %141 = tpu.matmul %140, %127, %cst_48 {dimension_numbers = #tpu.dot_dimension_numbers<[1], [0], [0], [1], [0, 0, 1, 1], [], []>, precision = #tpu.contract_precision<fp32>} : vector<8x8xf32>, vector<8x8xf32>, vector<8x8xf32> -> vector<8x8xf32>
    %142 = vector.extract_strided_slice %0 {offsets = [8, 8], sizes = [8, 8], strides = [1, 1]} : vector<16x32xf32> to vector<8x8xf32>
    %143 = arith.addf %142, %141 : vector<8x8xf32>
    %c8_49 = arith.constant 8 : index
    %c8_50 = arith.constant 8 : index
    %144 = vector.load %arg5[%c8_49, %c8_50] : memref<16x32xf32, #tpu.memory_space<vmem>>, vector<8x8xf32>
    tpu.vector_store %arg5[%c8_49, %c8_50], %143 {strides = array<i32>} : memref<16x32xf32, #tpu.memory_space<vmem>>, vector<8x8xf32>,
    %145 = vector.extract_strided_slice %24 {offsets = [8, 16], sizes = [8, 8], strides = [1, 1]} : vector<16x96xf32> to vector<8x8xf32>
    %146 = vector.extract_strided_slice %24 {offsets = [8, 48], sizes = [8, 8], strides = [1, 1]} : vector<16x96xf32> to vector<8x8xf32>
    %147 = vector.extract_strided_slice %24 {offsets = [8, 80], sizes = [8, 8], strides = [1, 1]} : vector<16x96xf32> to vector<8x8xf32>
    %cst_51 = arith.constant dense<0.000000e+00> : vector<8x8xf32>
    %148 = tpu.matmul %145, %146, %cst_51 {dimension_numbers = #tpu.dot_dimension_numbers<[1], [1], [0], [0], [0, 0, 1, 0], [], []>, precision = #tpu.contract_precision<fp32>} : vector<8x8xf32>, vector<8x8xf32>, vector<8x8xf32> -> vector<8x8xf32>
    %cst_52 = arith.constant 0.353553385 : f32
    %149 = vector.broadcast %cst_52 : f32 to vector<8x8xf32>
    %150 = arith.mulf %148, %149 : vector<8x8xf32>
    %cst_53 = arith.constant dense<0xFF800000> : vector<8xf32>
    %151 = vector.multi_reduction <maximumf>, %150, %cst_53 [1] : vector<8x8xf32> to vector<8xf32>
    %152 = vector.shape_cast %151 : vector<8xf32> to vector<8x1xf32>
    %153 = vector.broadcast %152 : vector<8x1xf32> to vector<8x8xf32>
    %154 = arith.subf %150, %153 : vector<8x8xf32>
    %155 = math.exp %154 : vector<8x8xf32>
    %cst_54 = arith.constant dense<0.000000e+00> : vector<8xf32>
    %156 = vector.multi_reduction <add>, %155, %cst_54 [1] : vector<8x8xf32> to vector<8xf32>
    %157 = vector.shape_cast %156 : vector<8xf32> to vector<8x1xf32>
    %158 = tpu.reciprocal %157 {approx = true} : vector<8x1xf32> -> vector<8x1xf32>
    %159 = vector.broadcast %158 : vector<8x1xf32> to vector<8x8xf32>
    %160 = arith.mulf %155, %159 : vector<8x8xf32>
    %cst_55 = arith.constant dense<0.000000e+00> : vector<8x8xf32>
    %161 = tpu.matmul %160, %147, %cst_55 {dimension_numbers = #tpu.dot_dimension_numbers<[1], [0], [0], [1], [0, 0, 1, 1], [], []>, precision = #tpu.contract_precision<fp32>} : vector<8x8xf32>, vector<8x8xf32>, vector<8x8xf32> -> vector<8x8xf32>
    %162 = vector.extract_strided_slice %0 {offsets = [8, 16], sizes = [8, 8], strides = [1, 1]} : vector<16x32xf32> to vector<8x8xf32>
    %163 = arith.addf %162, %161 : vector<8x8xf32>
    %c8_56 = arith.constant 8 : index
    %c16_57 = arith.constant 16 : index
    %164 = vector.load %arg5[%c8_56, %c16_57] : memref<16x32xf32, #tpu.memory_space<vmem>>, vector<8x8xf32>
    tpu.vector_store %arg5[%c8_56, %c16_57], %163 {strides = array<i32>} : memref<16x32xf32, #tpu.memory_space<vmem>>, vector<8x8xf32>,
    %165 = vector.extract_strided_slice %24 {offsets = [8, 24], sizes = [8, 8], strides = [1, 1]} : vector<16x96xf32> to vector<8x8xf32>
    %166 = vector.extract_strided_slice %24 {offsets = [8, 56], sizes = [8, 8], strides = [1, 1]} : vector<16x96xf32> to vector<8x8xf32>
    %167 = vector.extract_strided_slice %24 {offsets = [8, 88], sizes = [8, 8], strides = [1, 1]} : vector<16x96xf32> to vector<8x8xf32>
    %cst_58 = arith.constant dense<0.000000e+00> : vector<8x8xf32>
    %168 = tpu.matmul %165, %166, %cst_58 {dimension_numbers = #tpu.dot_dimension_numbers<[1], [1], [0], [0], [0, 0, 1, 0], [], []>, precision = #tpu.contract_precision<fp32>} : vector<8x8xf32>, vector<8x8xf32>, vector<8x8xf32> -> vector<8x8xf32>
    %cst_59 = arith.constant 0.353553385 : f32
    %169 = vector.broadcast %cst_59 : f32 to vector<8x8xf32>
    %170 = arith.mulf %168, %169 : vector<8x8xf32>
    %cst_60 = arith.constant dense<0xFF800000> : vector<8xf32>
    %171 = vector.multi_reduction <maximumf>, %170, %cst_60 [1] : vector<8x8xf32> to vector<8xf32>
    %172 = vector.shape_cast %171 : vector<8xf32> to vector<8x1xf32>
    %173 = vector.broadcast %172 : vector<8x1xf32> to vector<8x8xf32>
    %174 = arith.subf %170, %173 : vector<8x8xf32>
    %175 = math.exp %174 : vector<8x8xf32>
    %cst_61 = arith.constant dense<0.000000e+00> : vector<8xf32>
    %176 = vector.multi_reduction <add>, %175, %cst_61 [1] : vector<8x8xf32> to vector<8xf32>
    %177 = vector.shape_cast %176 : vector<8xf32> to vector<8x1xf32>
    %178 = tpu.reciprocal %177 {approx = true} : vector<8x1xf32> -> vector<8x1xf32>
    %179 = vector.broadcast %178 : vector<8x1xf32> to vector<8x8xf32>
    %180 = arith.mulf %175, %179 : vector<8x8xf32>
    %cst_62 = arith.constant dense<0.000000e+00> : vector<8x8xf32>
    %181 = tpu.matmul %180, %167, %cst_62 {dimension_numbers = #tpu.dot_dimension_numbers<[1], [0], [0], [1], [0, 0, 1, 1], [], []>, precision = #tpu.contract_precision<fp32>} : vector<8x8xf32>, vector<8x8xf32>, vector<8x8xf32> -> vector<8x8xf32>
    %182 = vector.extract_strided_slice %0 {offsets = [8, 24], sizes = [8, 8], strides = [1, 1]} : vector<16x32xf32> to vector<8x8xf32>
    %183 = arith.addf %182, %181 : vector<8x8xf32>
    %c8_63 = arith.constant 8 : index
    %c24_64 = arith.constant 24 : index
    %184 = vector.load %arg5[%c8_63, %c24_64] : memref<16x32xf32, #tpu.memory_space<vmem>>, vector<8x8xf32>
    tpu.vector_store %arg5[%c8_63, %c24_64], %183 {strides = array<i32>} : memref<16x32xf32, #tpu.memory_space<vmem>>, vector<8x8xf32>,
    return
  }
  func.func @transform_0(%arg0: i32) -> (i32, i32) {
    %c0_i32 = arith.constant 0 : i32
    %c0_i32_0 = arith.constant 0 : i32
    return %arg0, %c0_i32 : i32, i32
  }
  func.func @transform_1(%arg0: i32) -> (i32, i32) {
    %c0_i32 = arith.constant 0 : i32
    %c0_i32_0 = arith.constant 0 : i32
    %c0_i32_1 = arith.constant 0 : i32
    return %c0_i32, %c0_i32_0 : i32, i32
  }
  func.func @transform_2(%arg0: i32) -> (i32, i32) {
    %c0_i32 = arith.constant 0 : i32
    %c0_i32_0 = arith.constant 0 : i32
    %c0_i32_1 = arith.constant 0 : i32
    return %c0_i32, %c0_i32_0 : i32, i32
  }
  func.func @transform_3(%arg0: i32) -> (i32, i32) {
    %c0_i32 = arith.constant 0 : i32
    %c0_i32_0 = arith.constant 0 : i32
    %c0_i32_1 = arith.constant 0 : i32
    return %c0_i32, %c0_i32_0 : i32, i32
  }
  func.func @transform_4(%arg0: i32) -> (i32, i32) {
    %c0_i32 = arith.constant 0 : i32
    %c0_i32_0 = arith.constant 0 : i32
    return %arg0, %c0_i32 : i32, i32
  }
}

</mosaic_0001>

<bundles_post_ra>
// kernel: tpu_custom_call.1
= control target key start
LH: loop header
LB: loop body
LE: loop exit
PB: predicated region body
PF: predicated region fallthrough
CT: control target
= control target key end

     0   :  { %9 = vsyncpa [#allocation3], 0  ;;  %s9507_s0 = inlined_call_operand.hbm [shape: f32[16,32], index: 0, kind: input, shape index: {}]   ;;  %s9508_s1 = inlined_call_operand.vmem [shape: f32[1,32], index: 1, kind: input, shape index: {}]   ;;  %s9509_s2 = inlined_call_operand.vmem [shape: f32[1,32], index: 2, kind: input, shape index: {}]   ;;  %s9510_s3 = inlined_call_operand.hbm [shape: f32[32,96], index: 3, kind: input, shape index: {}]   ;;  %s9511_s4 = inlined_call_operand.hbm [shape: f32[16,32], index: 4, kind: output, shape index: {}]  }
   0x1   :  { %10 = vsyncpa [#allocation6], 0 }
   0x2   :  { %11 = vsyncpa [#allocation4], 0  ;;  %s8936_s15 = smov [#allocation2]  }
   0x3   :  { %s17_s16 = sshll.u32 %s8936_s15, 4  ;;  %s18_s16 = int_to_ptr.vmem [resolvable:$true] %s17_s16 }
   0x4   :  { %s8878_s17 = scalar_lea.vmem %s18_s16, 256  ;;  %p8883_p1 = scmp.lt.s32.totalorder %s18_s16, %s18_s16 }
   0x5   :  { %p8879_p0 = scmp.ne.s32.totalorder %s18_s16, %s8878_s17  ;;  %p8884_p2 = scmp.lt.s32.totalorder %s8878_s17, %s8878_s17 }
   0x7   :  { %p8885_p3 = por %p8884_p2, %p8883_p1 }
   0x9   :  { %p8886_p4 = pnand %p8885_p3, %p8879_p0 }
   0xb   :  { %8889 = shalt.err (!%p8886_p4)
}
   0xc   :  { %s8937_s18 = smov 128   ;;  %s8938_s19 = smov 8  }
   0xd   :  { %23 = dma.hbm_to_vmem [thread:$0]  %s9507_s0, 256, %s18_s16, [#allocation3], %s8937_s18, %s8937_s18, %s8938_s19  }
   0xe   :  { %s8939_s22 = smov [#allocation5]  }
   0xf   :  { %s33_s23 = sshll.u32 %s8939_s22, 4  ;;  %s34_s23 = int_to_ptr.vmem [resolvable:$true] %s33_s23 }
  0x10   :  { %s8898_s24 = scalar_lea.vmem %s34_s23, 512  ;;  %p8903_p6 = scmp.lt.s32.totalorder %s34_s23, %s34_s23 }
  0x11   :  { %p8899_p5 = scmp.ne.s32.totalorder %s34_s23, %s8898_s24  ;;  %p8904_p7 = scmp.lt.s32.totalorder %s8898_s24, %s8898_s24 }
  0x13   :  { %p8905_p8 = por %p8904_p7, %p8903_p6 }
  0x15   :  { %p8906_p9 = pnand %p8905_p8, %p8899_p5 }
  0x17   :  { %8909 = shalt.err (!%p8906_p9)
}
  0x18   :  { %39 = dma.hbm_to_vmem [thread:$0]  %s9510_s3, 512, %s34_s23, [#allocation6], %s8937_s18, %s8937_s18, %s8938_s19  }
  0x19   :  { %8930 = dma.done.wait [#allocation3], 256  }
  0x1a   :  { %8931 = vsyncadd [#allocation3], 4294967040 }
  0x1b   :  { %8932 = dma.done.wait [#allocation6], 512  }
  0x1c   :  { %8933 = vsyncadd [#allocation6], 4294966784  ;;  %vm50_vm0 = vcmask 261120   ;;  %v8993_v0 = vld [vmem:[#allocation2] sm:$0xff]  ;;  %v47_v1 = vld [vmem:[#allocation2 + $0x8] sm:$0xff]  ;;  %vm8941_vm1 = vmmov 0  }
  0x1d   :  { %v51_v2 = vsel %vm50_vm0, %v8993_v0, 0.0  ;;  %v54_v3 = vsel %vm50_vm0, %v47_v1, 0.0  ;;  %v97_v14 = vld [vmem:[#allocation5 + $0x18] sm:$0xff]  ;;  %v96_v15 = vld [vmem:[#allocation5 + $0x10] sm:$0xff]  ;;  %v95_v16 = vld [vmem:[#allocation5 + $0x8] sm:$0xff]  ;;  %vm635_vm2 = vcmask 64512  }
  0x1e   :  { %52 = vadd.xlane.f32.xlu0 %v51_v2  ;;  %v9005_v17 = vand.u32 4294901760, %v97_v14  ;;  %v9007_v18 = vand.u32 4294901760, %v96_v15  ;;  %v9009_v19 = vand.u32 4294901760, %v95_v16  ;;  %v94_v31 = vld [vmem:[#allocation5] sm:$0xff]  ;;  %v8036_v45 = vld [vmem:[%s9508_s1] ss:$0 sm:$0xff] }
  0x1f   :  { %v9041_v32 = vand.u32 4294901760, %v94_v31  ;;  %v8037_v47 = vld [vmem:[%s9509_s2] ss:$0 sm:$0xff]  ;;  %s8942_s1 = smov 96   ;;  %s8943_s2 = smov 88   ;;  %vm2475_vm3 = vcmask 130112  }
  0x20   :  { %v9012_v20 = vsub.f32 %v97_v14, %v9005_v17  ;;  %v9015_v21 = vsub.f32 %v96_v15, %v9007_v18  ;;  %v9018_v22 = vsub.f32 %v95_v16, %v9009_v19  ;;  %8266 = vmatprep.subr.mxu0 %v9005_v17  ;;  %v8940_v14 = vmov 0.0   ;;  %s8944_s29 = smov 64   ;;  %s8945_s30 = smov 120  }
  0x21   :  { %8267 = vmatpush3.msra.mxu0 %v9005_v17  ;;  %v9044_v34 = vsub.f32 %v94_v31, %v9041_v32  ;;  %s8946_s5 = smov 56   ;;  %s8947_s6 = smov 112   ;;  %vm3400_vm4 = vcmask 195712   ;;  %vm4325_vm5 = vcmask 261312  }
  0x22   :  { %55 = vadd.xlane.f32.xlu0 %v54_v3  ;;  %v9023_v23 = vand.u32 4294901760, %v9012_v20  ;;  %v9026_v24 = vand.u32 4294901760, %v9015_v21  ;;  %v9029_v25 = vand.u32 4294901760, %v9018_v22  ;;  %8268 = vmatprep.subr.mxu0 %v9007_v18  ;;  %s8948_s7 = smov 80   ;;  %s8949_s8 = smov 72  }
  0x23   :  { %8269 = vmatpush3.msra.mxu0 %v9007_v18  ;;  %v9049_v35 = vand.u32 4294901760, %v9044_v34  ;;  %s8950_s9 = smov 104   ;;  %s8951_s10 = smov 48  }
  0x24   :  { %v221_v26 = vsub.f32 %v9012_v20, %v9023_v23  ;;  %v228_v27 = vsub.f32 %v9015_v21, %v9026_v24  ;;  %v235_v28 = vsub.f32 %v9018_v22, %v9029_v25  ;;  %8270 = vmatprep.subr.mxu0 %v9009_v19  ;;  %s8952_s11 = smov 40   ;;  %s8953_s12 = smov 16  }
  0x25   :  { %8271 = vmatpush3.msra.mxu0 %v9009_v19  ;;  %v242_v36 = vsub.f32 %v9044_v34, %v9049_v35  ;;  %s8954_s13 = smov 24   ;;  %s8955_s14 = smov [#allocation7]  }
  0x26   :  { %v222_v29 = vand.u32 4294901760, %v221_v26  ;;  %v229_v30 = vand.u32 4294901760, %v228_v27  ;;  %v236_v33 = vand.u32 4294901760, %v235_v28  ;;  %8272 = vmatprep.subr.mxu0 %v9041_v32  ;;  %s8023_s15 = sshll.u32 %s8955_s14, 4  ;;  %s8024_s15 = int_to_ptr.vmem [resolvable:$true] %s8023_s15 }
  0x27   :  { %8273 = vmatpush3.msra.mxu0 %v9041_v32  ;;  %v243_v37 = vand.u32 4294901760, %v242_v36  ;;  %s8910_s16 = scalar_lea.vmem %s8024_s15, 256  ;;  %p8915_p11 = scmp.lt.s32.totalorder %s8024_s15, %s8024_s15 }
  0x28   :  { %8277 = vmatprep.subr.mxu1 %v222_v29  ;;  %8288 = vmatprep.subr.mxu0 %v9012_v20  ;;  %p8911_p10 = scmp.ne.s32.totalorder %s8024_s15, %s8910_s16  ;;  %p8916_p12 = scmp.lt.s32.totalorder %s8910_s16, %s8910_s16 }
  0x29   :  { %8278 = vmatpush3.msra.mxu1 %v222_v29 }
  0x2a   :  { %8279 = vmatprep.subr.mxu1 %v229_v30  ;;  %p8917_p13 = por %p8916_p12, %p8915_p11 }
  0x2b   :  { %8280 = vmatpush3.msra.mxu1 %v229_v30 }
  0x2c   :  { %8281 = vmatprep.subr.mxu1 %v236_v33  ;;  %p8918_p0 = pnand %p8917_p13, %p8911_p10 }
  0x2d   :  { %8282 = vmatpush3.msra.mxu1 %v236_v33 }
  0x2e   :  { %8283 = vmatprep.subr.mxu1 %v243_v37 }
  0x2f   :  { %8284 = vmatpush3.msra.mxu1 %v243_v37 }
  0x30   :  { %8299 = vmatprep.subr.mxu1 %v9005_v17 }
  0xa7   :  { %v53_v4 = vpop.xlane.xlu0 %52 }
  0xa8   :  { %v58_v5 = vmul.f32 0.03125, %v53_v4 }
  0xaa   :  { %v60_v6 = vsub.f32 %v8993_v0, %v58_v5 }
  0xab   :  { %v56_v7 = vpop.xlane.xlu0 %55 }
  0xac   :  { %v59_v8 = vmul.f32 0.03125, %v56_v7  ;;  %v62_v9 = vmul.f32 %v60_v6, %v60_v6 }
  0xae   :  { %v8999_v10 = vsub.f32 %v47_v1, %v59_v8  ;;  %v64_v11 = vsel %vm50_vm0, %v62_v9, 0.0 }
  0xaf   :  { %65 = vadd.xlane.f32.xlu1 %v64_v11 }
  0xb0   :  { %v63_v12 = vmul.f32 %v8999_v10, %v8999_v10 }
  0xb2   :  { %v67_v13 = vsel %vm50_vm0, %v63_v12, 0.0 }
  0xb3   :  { %68 = vadd.xlane.f32.xlu1 %v67_v13 }
 0x138   :  { %v66_v38 = vpop.xlane.xlu1 %65 }
 0x139   :  { %v70_v39 = vmul.f32 0.03125, %v66_v38 }
 0x13b   :  { %v72_v40 = vadd.f32 1e-05, %v70_v39 }
 0x13c   :  { %v69_v41 = vpop.xlane.xlu1 %68 }
 0x13d   :  { %8832 = vrsqrt.f32 %v72_v40  ;;  %v71_v42 = vmul.f32 0.03125, %v69_v41 }
 0x13f   :  { %v73_v43 = vadd.f32 1e-05, %v71_v42 }
 0x141   :  { %8834 = vrsqrt.f32 %v73_v43 }
 0x14a   :  { %v8833_v44 = vpop.eup %8832 }
 0x14b   :  { %v76_v46 = vmul.f32 %v8833_v44, %v60_v6 }
 0x14d   :  { %v84_v48 = vmul.f32 %v8036_v45, %v76_v46 }
 0x14e   :  { %v8835_v49 = vpop.eup %8834 }
 0x14f   :  { %v92_v50 = vadd.f32 %v8037_v47, %v84_v48  ;;  %v77_v51 = vmul.f32 %v8835_v49, %v8999_v10 }
 0x151   :  { %v99_v52 = vsel %vm50_vm0, %v92_v50, 0  ;;  %v85_v53 = vmul.f32 %v8036_v45, %v77_v51 }
 0x152   :  { %v173_v54 = vand.u32 4294901760, %v99_v52 }
 0x153   :  { %v93_v55 = vadd.f32 %v8037_v47, %v85_v53 }
 0x154   :  { %8285 = vmatprep.mubr.f32.mxu1 %v173_v54  ;;  %v174_v56 = vsub.f32 %v99_v52, %v173_v54 }
 0x155   :  { %v102_v57 = vsel %vm50_vm0, %v93_v55, 0 }
 0x156   :  { %v183_v58 = vand.u32 4294901760, %v102_v57  ;;  %v175_v59 = vand.u32 4294901760, %v174_v56 }
 0x158   :  { %v184_v60 = vsub.f32 %v102_v57, %v183_v58  ;;  %8286 = vmatmul.mubr.f32.vlgmr.msra.gmra.mxu1 %v183_v58  ;;  %v176_v61 = vsub.f32 %v174_v56, %v175_v59 }
 0x159   :  { %8300 = vmatpush3.msra.mxu1 %v9005_v17  ;;  %8307 = vmatprep.mubr.f32.mxu1 %v175_v59 }
 0x15a   :  { %8301 = vmatprep.subr.mxu1 %v9007_v18  ;;  %v177_v62 = vand.u32 4294901760, %v176_v61  ;;  %v185_v63 = vand.u32 4294901760, %v184_v60 }
 0x15b   :  { %8302 = vmatpush3.msra.mxu1 %v9007_v18 }
 0x15c   :  { %8303 = vmatprep.subr.mxu1 %v9009_v19  ;;  %8274 = vmatprep.mubr.f32.mxu0 %v177_v62  ;;  %v186_v1 = vsub.f32 %v184_v60, %v185_v63 }
 0x15d   :  { %8304 = vmatpush3.msra.mxu1 %v9009_v19 }
 0x15e   :  { %8305 = vmatprep.subr.mxu1 %v9041_v32  ;;  %v187_v2 = vand.u32 4294901760, %v186_v1 }
 0x15f   :  { %8306 = vmatpush3.msra.mxu1 %v9041_v32 }
 0x160   :  { %8308 = vmatmul.mubr.f32.vlgmr.msra.gmra.mxu1 %v185_v63  ;;  %8321 = vmatprep.subr.mxu1 %v9005_v17 }
 0x161   :  { %8275 = vmatmul.mubr.f32.vlgmr.msra.gmra.mxu0 %v187_v2  ;;  %8322 = vmatpush3.msra.mxu1 %v9005_v17 }
 0x162   :  { %8289 = vmatpush3.msra.mxu0 %v9012_v20  ;;  %8329 = vmatprep.mubr.f32.mxu1 %v173_v54 }
 0x163   :  { %8290 = vmatprep.subr.mxu0 %v9015_v21  ;;  %8296 = vmatprep.mubr.f32.mxu0 %v174_v56 }
 0x164   :  { %8323 = vmatprep.subr.mxu1 %v9007_v18  ;;  %8291 = vmatpush3.msra.mxu0 %v9015_v21 }
 0x165   :  { %8324 = vmatpush3.msra.mxu1 %v9007_v18  ;;  %8292 = vmatprep.subr.mxu0 %v9018_v22 }
 0x166   :  { %8325 = vmatprep.subr.mxu1 %v9009_v19  ;;  %8293 = vmatpush3.msra.mxu0 %v9018_v22 }
 0x167   :  { %8326 = vmatpush3.msra.mxu1 %v9009_v19  ;;  %8294 = vmatprep.subr.mxu0 %v9044_v34 }
 0x168   :  { %8327 = vmatprep.subr.mxu1 %v9041_v32  ;;  %8295 = vmatpush3.msra.mxu0 %v9044_v34 }
 0x169   :  { %8328 = vmatpush3.msra.mxu1 %v9041_v32  ;;  %8297 = vmatmul.mubr.f32.vlgmr.msra.gmra.mxu0 %v184_v60 }
 0x16a   :  { %8310 = vmatprep.subr.mxu0 %v9023_v23  ;;  %8330 = vmatmul.mubr.f32.vlgmr.msra.gmra.mxu1 %v183_v58 }
 0x16b   :  { %8311 = vmatpush3.msra.mxu0 %v9023_v23  ;;  %8318 = vmatprep.mubr.f32.mxu0 %v173_v54 }
 0x16c   :  { %8312 = vmatprep.subr.mxu0 %v9026_v24  ;;  %8337 = vmatprep.subr.mxu1 %v8940_v14 }
 0x16d   :  { %8313 = vmatpush3.msra.mxu0 %v9026_v24  ;;  %8339 = vmatprep.mubr.msk.f32.mxu1 %vm8941_vm1, %v8940_v14 }
 0x16e   :  { %8314 = vmatprep.subr.mxu0 %v9029_v25 }
 0x16f   :  { %8315 = vmatpush3.msra.mxu0 %v9029_v25 }
 0x170   :  { %8316 = vmatprep.subr.mxu0 %v9049_v35 }
 0x171   :  { %8317 = vmatpush3.msra.mxu0 %v9049_v35 }
 0x172   :  { %8319 = vmatmul.mubr.f32.vlgmr.msra.gmra.mxu0 %v183_v58  ;;  %8332 = vmatprep.subr.mxu0 %v8940_v14 }
 0x173   :  { %8334 = vmatprep.mubr.msk.f32.mxu0 %vm8941_vm1, %v8940_v14 }
 0x218   :  { %v8287_v3 = vpop.f32.mrf.mxu1 }
 0x21a   :  { %v280_v7 = vpop.f32.mrf.mxu1 }
 0x220   :  { %v8309_v10 = vpop.f32.mrf.mxu1 }
 0x221   :  { %v8276_v4 = vpop.f32.mrf.mxu0 }
 0x222   :  { %v287_v5 = vadd.f32 %v8287_v3, %v8276_v4  ;;  %v450_v16 = vpop.f32.mrf.mxu1 }
 0x223   :  { %v179_v6 = vpop.f32.mrf.mxu0 }
 0x224   :  { %v281_v13 = vadd.f32 %v280_v7, %v179_v6 }
 0x229   :  { %v8298_v8 = vpop.f32.mrf.mxu0 }
 0x22a   :  { %v374_v9 = vadd.f32 %v8298_v8, %v287_v5  ;;  %v8331_v17 = vpop.f32.mrf.mxu1 }
 0x22b   :  { %v366_v11 = vpop.f32.mrf.mxu0 }
 0x22c   :  { %v459_v12 = vadd.f32 %v8309_v10, %v374_v9  ;;  %v367_v15 = vadd.f32 %v366_v11, %v281_v13  ;;  %v622_v24 = vpop.f32.mrf.mxu1 }
 0x22e   :  { %v451_v20 = vadd.f32 %v450_v16, %v367_v15 }
 0x232   :  { %v8320_v18 = vpop.f32.mrf.mxu0 }
 0x233   :  { %v548_v19 = vadd.f32 %v8320_v18, %v459_v12 }
 0x234   :  { %v541_v21 = vpop.f32.mrf.mxu0 }
 0x235   :  { %v9100_v22 = vadd.f32 %v8331_v17, %v548_v19  ;;  %v542_v23 = vadd.f32 %v541_v21, %v451_v20 }
 0x237   :  { %v9102_v25 = vadd.f32 %v622_v24, %v542_v23 }
 0x239   :  { %633 = vrot.lane.b32.xlu0 %v9102_v25, %s8942_s1  ;;  %v636_v26 = vsel %vm635_vm2, %v9102_v25, 0 }
 0x23a   :  { %v706_v27 = vand.u32 4294901760, %v636_v26 }
 0x23c   :  { %v707_v28 = vsub.f32 %v636_v26, %v706_v27 }
 0x23d   :  { %1554 = vrot.lane.b32.xlu0 %v9102_v25, %s8943_s2 }
 0x23e   :  { %v708_v29 = vand.u32 4294901760, %v707_v28 }
 0x240   :  { %v709_v32 = vsub.f32 %v707_v28, %v708_v29 }
 0x242   :  { %v710_v35 = vand.u32 4294901760, %v709_v32 }
 0x2ab   :  { %v634_v30 = vpop.permute.xlu0 %633 }
 0x2ac   :  { %v638_v31 = vsel %vm635_vm2, %v634_v30, 0 }
 0x2ad   :  { %v671_v33 = vand.u32 4294901760, %v638_v31 }
 0x2af   :  { %v748_v34 = vsub.f32 %v638_v31, %v671_v33  ;;  %8333 = vmatpush3.xpose.msra.mxu0 %v671_v33  ;;  %v1555_v2 = vpop.permute.xlu0 %1554 }
 0x2b0   :  { %8342 = vmatprep.subr.mxu0 %v8940_v14  ;;  %v1558_v5 = vsel %vm635_vm2, %v1555_v2, 0 }
 0x2b1   :  { %v749_v36 = vand.u32 4294901760, %v748_v34  ;;  %v1591_v7 = vand.u32 4294901760, %v1558_v5 }
 0x2b2   :  { %8335 = vmatmul.mubr.f32.vlgmr.msra.gmra.mxu0 %v710_v35 }
 0x2b3   :  { %v750_v37 = vsub.f32 %v748_v34, %v749_v36  ;;  %8343 = vmatpush3.xpose.msra.mxu0 %v748_v34  ;;  %8344 = vmatprep.mubr.msk.f32.mxu0 %vm8941_vm1, %v8940_v14  ;;  %v1668_v11 = vsub.f32 %v1558_v5, %v1591_v7 }
 0x2b4   :  { %8352 = vmatprep.subr.mxu0 %v8940_v14 }
 0x2b5   :  { %v751_v38 = vand.u32 4294901760, %v750_v37  ;;  %v1669_v17 = vand.u32 4294901760, %v1668_v11 }
 0x2b6   :  { %8345 = vmatmul.mubr.f32.vlgmr.msra.gmra.mxu0 %v707_v28 }
 0x2b7   :  { %8338 = vmatpush3.xpose.msra.mxu1 %v751_v38  ;;  %8353 = vmatpush3.xpose.msra.mxu0 %v749_v36  ;;  %v1670_v23 = vsub.f32 %v1668_v11, %v1669_v17 }
 0x2b8   :  { %8354 = vmatprep.mubr.msk.f32.mxu0 %vm8941_vm1, %v8940_v14  ;;  %8347 = vmatprep.subr.mxu1 %v8940_v14 }
 0x2b9   :  { %8362 = vmatprep.subr.mxu0 %v8940_v14  ;;  %v1671_v28 = vand.u32 4294901760, %v1670_v23 }
 0x2ba   :  { %8340 = vmatmul.mubr.f32.vlgmr.msra.gmra.mxu1 %v706_v27  ;;  %8355 = vmatmul.mubr.f32.vlgmr.msra.gmra.mxu0 %v706_v27 }
 0x2bb   :  { %8348 = vmatpush3.xpose.msra.mxu1 %v671_v33  ;;  %8349 = vmatprep.mubr.msk.f32.mxu1 %vm8941_vm1, %v8940_v14 }
 0x2bc   :  { %8357 = vmatprep.subr.mxu1 %v8940_v14  ;;  %8364 = vmatprep.mubr.msk.f32.mxu0 %vm8941_vm1, %v8940_v14 }
 0x2be   :  { %8350 = vmatmul.mubr.f32.vlgmr.msra.gmra.mxu1 %v708_v29 }
 0x2bf   :  { %8358 = vmatpush3.xpose.msra.mxu1 %v671_v33  ;;  %8359 = vmatprep.mubr.msk.f32.mxu1 %vm8941_vm1, %v8940_v14 }
 0x2c0   :  { %8367 = vmatprep.subr.mxu1 %v8940_v14 }
 0x2c2   :  { %8360 = vmatmul.mubr.f32.vlgmr.msra.gmra.mxu1 %v706_v27 }
 0x2c3   :  { %8369 = vmatprep.mubr.msk.f32.mxu1 %vm8941_vm1, %v8940_v14 }
 0x372   :  { %v712_v39 = vpop.f32.mrf.mxu0 }
 0x374   :  { %v8336_v40 = vpop.f32.mrf.mxu0 }
 0x376   :  { %v862_v41 = vpop.f32.mrf.mxu0 }
 0x378   :  { %v8346_v42 = vpop.f32.mrf.mxu0 }
 0x37a   :  { %v788_v43 = vpop.f32.mrf.mxu1  ;;  %v1010_v44 = vpop.f32.mrf.mxu0 }
 0x37b   :  { %v789_v45 = vadd.f32 %v788_v43, %v712_v39 }
 0x37c   :  { %v8341_v46 = vpop.f32.mrf.mxu1  ;;  %v8356_v47 = vpop.f32.mrf.mxu0 }
 0x37d   :  { %v863_v48 = vadd.f32 %v862_v41, %v789_v45 }
 0x37e   :  { %v936_v49 = vpop.f32.mrf.mxu1 }
 0x37f   :  { %v937_v50 = vadd.f32 %v936_v49, %v863_v48 }
 0x380   :  { %v8351_v51 = vpop.f32.mrf.mxu1 }
 0x381   :  { %v1011_v52 = vadd.f32 %v1010_v44, %v937_v50 }
 0x382   :  { %v1082_v53 = vpop.f32.mrf.mxu1 }
 0x383   :  { %v1083_v54 = vadd.f32 %v1082_v53, %v1011_v52 }
 0x384   :  { %v8361_v55 = vpop.f32.mrf.mxu1 }
 0x385   :  { %v1086_v56 = vmul.f32 0.35355338, %v1083_v54 }
 0x387   :  { %v1087_v57 = vsel %vm635_vm2, %v1086_v56, -inf }
 0x388   :  { %1088 = vmax.xlane.f32.xlu1 %v1087_v57 }
 0x411   :  { %v1089_v58 = vpop.xlane.xlu1 %1088 }
 0x412   :  { %v1090_v59 = vsub.f32 %v1086_v56, %v1089_v58 }
 0x414   :  { %v1091_v60 = vmul.f32 1.442695, %v1090_v59 }
 0x416   :  { %8836 = vpow2.f32 %v1091_v60 }
 0x423   :  { %v8837_v61 = vpop.eup %8836 }
 0x424   :  { %v1093_v62 = vsel %vm635_vm2, %v8837_v61, 0.0 }
 0x425   :  { %1094 = vadd.xlane.f32.xlu1 %v1093_v62 }
 0x436   :  { %1098 = vrot.lane.b32.xlu1 %v9102_v25, %s8944_s29 }
 0x43a   :  { %1552 = vrot.lane.b32.xlu1 %v9102_v25, %s8945_s30 }
 0x4ae   :  { %v1095_v63 = vpop.xlane.xlu1 %1094 }
 0x4af   :  { %8838 = vrcp.f32 %v1095_v63 }
 0x4b2   :  { %v1099_v1 = vpop.permute.xlu1 %1098 }
 0x4b3   :  { %v1135_v3 = vand.u32 4294901760, %v1099_v1 }
 0x4b5   :  { %v1212_v4 = vsub.f32 %v1099_v1, %v1135_v3  ;;  %8363 = vmatpush3.msra.mxu0 %v1135_v3 }
 0x4b6   :  { %8372 = vmatprep.subr.mxu0 %v8940_v14  ;;  %v1553_v13 = vpop.permute.xlu1 %1552 }
 0x4b7   :  { %v1213_v6 = vand.u32 4294901760, %v1212_v4  ;;  %v1556_v18 = vsel %vm635_vm2, %v1553_v13, 0 }
 0x4b8   :  { %v1626_v20 = vand.u32 4294901760, %v1556_v18 }
 0x4b9   :  { %v1214_v8 = vsub.f32 %v1212_v4, %v1213_v6 }
 0x4ba   :  { %v1627_v26 = vsub.f32 %v1556_v18, %v1626_v20 }
 0x4bb   :  { %v1215_v9 = vand.u32 4294901760, %v1214_v8 }
 0x4bc   :  { %v8839_v10 = vpop.eup %8838  ;;  %v1628_v29 = vand.u32 4294901760, %v1627_v26 }
 0x4bd   :  { %8368 = vmatpush3.msra.mxu1 %v1215_v9  ;;  %v1097_v12 = vmul.f32 %v8839_v10, %v8837_v61 }
 0x4be   :  { %8377 = vmatprep.subr.mxu1 %v8940_v14  ;;  %v1629_v30 = vsub.f32 %v1627_v26, %v1628_v29 }
 0x4bf   :  { %v1102_v15 = vsel %vm635_vm2, %v1097_v12, 0 }
 0x4c0   :  { %v1170_v16 = vand.u32 4294901760, %v1102_v15  ;;  %v1630_v31 = vand.u32 4294901760, %v1629_v30 }
 0x4c2   :  { %v1171_v19 = vsub.f32 %v1102_v15, %v1170_v16  ;;  %8370 = vmatmul.mubr.f32.vlgmr.msra.gmra.mxu1 %v1170_v16 }
 0x4c3   :  { %8378 = vmatpush3.msra.mxu1 %v1135_v3  ;;  %8379 = vmatprep.mubr.msk.f32.mxu1 %vm8941_vm1, %v8940_v14 }
 0x4c4   :  { %8387 = vmatprep.subr.mxu1 %v8940_v14  ;;  %v1172_v21 = vand.u32 4294901760, %v1171_v19 }
 0x4c6   :  { %8380 = vmatmul.mubr.f32.vlgmr.msra.gmra.mxu1 %v1172_v21  ;;  %v1173_v24 = vsub.f32 %v1171_v19, %v1172_v21 }
 0x4c7   :  { %8388 = vmatpush3.msra.mxu1 %v1135_v3  ;;  %8389 = vmatprep.mubr.msk.f32.mxu1 %vm8941_vm1, %v8940_v14 }
 0x4c8   :  { %8397 = vmatprep.subr.mxu1 %v8940_v14  ;;  %v1174_v27 = vand.u32 4294901760, %v1173_v24 }
 0x4ca   :  { %8365 = vmatmul.mubr.f32.vlgmr.msra.gmra.mxu0 %v1174_v27  ;;  %8390 = vmatmul.mubr.f32.vlgmr.msra.gmra.mxu1 %v1170_v16 }
 0x4cb   :  { %8373 = vmatpush3.msra.mxu0 %v1212_v4  ;;  %8398 = vmatpush3.xpose.msra.mxu1 %v1671_v28 }
 0x4cc   :  { %8374 = vmatprep.mubr.msk.f32.mxu0 %vm8941_vm1, %v8940_v14  ;;  %8382 = vmatprep.subr.mxu0 %v8940_v14 }
 0x4cd   :  { %8399 = vmatprep.mubr.msk.f32.mxu1 %vm8941_vm1, %v8940_v14  ;;  %8407 = vmatprep.subr.mxu1 %v8940_v14 }
 0x4ce   :  { %8375 = vmatmul.mubr.f32.vlgmr.msra.gmra.mxu0 %v1171_v19  ;;  %8400 = vmatmul.mubr.f32.vlgmr.msra.gmra.mxu1 %v1626_v20 }
 0x4cf   :  { %8383 = vmatpush3.msra.mxu0 %v1213_v6  ;;  %8408 = vmatpush3.xpose.msra.mxu1 %v1591_v7 }
 0x4d0   :  { %8384 = vmatprep.mubr.msk.f32.mxu0 %vm8941_vm1, %v8940_v14  ;;  %8392 = vmatprep.subr.mxu0 %v8940_v14 }
 0x4d1   :  { %8409 = vmatprep.mubr.msk.f32.mxu1 %vm8941_vm1, %v8940_v14  ;;  %8417 = vmatprep.subr.mxu1 %v8940_v14 }
 0x4d2   :  { %8385 = vmatmul.mubr.f32.vlgmr.msra.gmra.mxu0 %v1170_v16  ;;  %8410 = vmatmul.mubr.f32.vlgmr.msra.gmra.mxu1 %v1628_v29 }
 0x4d3   :  { %8393 = vmatpush3.xpose.msra.mxu0 %v1591_v7  ;;  %8418 = vmatpush3.xpose.msra.mxu1 %v1591_v7 }
 0x4d4   :  { %8394 = vmatprep.mubr.msk.f32.mxu0 %vm8941_vm1, %v8940_v14  ;;  %8402 = vmatprep.subr.mxu0 %v8940_v14 }
 0x4d5   :  { %8419 = vmatprep.mubr.msk.f32.mxu1 %vm8941_vm1, %v8940_v14  ;;  %8427 = vmatprep.subr.mxu1 %v8940_v14 }
 0x4d6   :  { %8395 = vmatmul.mubr.f32.vlgmr.msra.gmra.mxu0 %v1630_v31  ;;  %8420 = vmatmul.mubr.f32.vlgmr.msra.gmra.mxu1 %v1626_v20 }
 0x4d7   :  { %8403 = vmatpush3.xpose.msra.mxu0 %v1668_v11  ;;  %8404 = vmatprep.mubr.msk.f32.mxu0 %vm8941_vm1, %v8940_v14 }
 0x4d8   :  { %8412 = vmatprep.subr.mxu0 %v8940_v14  ;;  %8429 = vmatprep.mubr.msk.f32.mxu1 %vm8941_vm1, %v8940_v14 }
 0x4da   :  { %8405 = vmatmul.mubr.f32.vlgmr.msra.gmra.mxu0 %v1627_v26 }
 0x4db   :  { %8413 = vmatpush3.xpose.msra.mxu0 %v1669_v17  ;;  %8414 = vmatprep.mubr.msk.f32.mxu0 %vm8941_vm1, %v8940_v14 }
 0x4dc   :  { %8422 = vmatprep.subr.mxu0 %v8940_v14 }
 0x4de   :  { %8415 = vmatmul.mubr.f32.vlgmr.msra.gmra.mxu0 %v1626_v20 }
 0x4df   :  { %8424 = vmatprep.mubr.msk.f32.mxu0 %vm8941_vm1, %v8940_v14 }
 0x582   :  { %v1252_v32 = vpop.f32.mrf.mxu1 }
 0x584   :  { %v8371_v33 = vpop.f32.mrf.mxu1 }
 0x586   :  { %v1400_v34 = vpop.f32.mrf.mxu1 }
 0x588   :  { %v8381_v35 = vpop.f32.mrf.mxu1 }
 0x58a   :  { %v1176_v36 = vpop.f32.mrf.mxu0  ;;  %v1546_v37 = vpop.f32.mrf.mxu1 }
 0x58b   :  { %v1253_v40 = vadd.f32 %v1252_v32, %v1176_v36 }
 0x58c   :  { %v8366_v38 = vpop.f32.mrf.mxu0  ;;  %v8391_v39 = vpop.f32.mrf.mxu1 }
 0x58e   :  { %v1326_v41 = vpop.f32.mrf.mxu0  ;;  %v1708_v42 = vpop.f32.mrf.mxu1 }
 0x58f   :  { %v1327_v43 = vadd.f32 %v1326_v41, %v1253_v40 }
 0x590   :  { %v8376_v44 = vpop.f32.mrf.mxu0  ;;  %v8401_v45 = vpop.f32.mrf.mxu1 }
 0x591   :  { %v1401_v46 = vadd.f32 %v1400_v34, %v1327_v43 }
 0x592   :  { %v1474_v47 = vpop.f32.mrf.mxu0  ;;  %v1856_v48 = vpop.f32.mrf.mxu1 }
 0x593   :  { %v1475_v49 = vadd.f32 %v1474_v47, %v1401_v46 }
 0x594   :  { %v8386_v50 = vpop.f32.mrf.mxu0  ;;  %v8411_v51 = vpop.f32.mrf.mxu1 }
 0x595   :  { %v1547_v52 = vadd.f32 %v1546_v37, %v1475_v49 }
 0x596   :  { %v1632_v53 = vpop.f32.mrf.mxu0  ;;  %v2002_v54 = vpop.f32.mrf.mxu1 }
 0x597   :  { %v1550_v55 = vadd.f32 %v1547_v52, %v8993_v0  ;;  %v1709_v58 = vadd.f32 %v1708_v42, %v1632_v53 }
 0x598   :  { %v8396_v56 = vpop.f32.mrf.mxu0  ;;  %v8421_v57 = vpop.f32.mrf.mxu1 }
 0x599   :  { %1551 = vst.msk [vmem:[#allocation7] sm:$0xff] %vm635_vm2, %v1550_v55 }
 0x59a   :  { %v1782_v59 = vpop.f32.mrf.mxu0 }
 0x59b   :  { %v1783_v60 = vadd.f32 %v1782_v59, %v1709_v58 }
 0x59c   :  { %v8406_v61 = vpop.f32.mrf.mxu0 }
 0x59d   :  { %v1857_v62 = vadd.f32 %v1856_v48, %v1783_v60 }
 0x59e   :  { %v1930_v63 = vpop.f32.mrf.mxu0 }
 0x59f   :  { %v1931_v1 = vadd.f32 %v1930_v63, %v1857_v62 }
 0x5a0   :  { %v8416_v2 = vpop.f32.mrf.mxu0 }
 0x5a1   :  { %v2003_v3 = vadd.f32 %v2002_v54, %v1931_v1 }
 0x5a3   :  { %v2006_v4 = vmul.f32 0.35355338, %v2003_v3 }
 0x5a5   :  { %v2007_v5 = vsel %vm635_vm2, %v2006_v4, -inf }
 0x5a6   :  { %2008 = vmax.xlane.f32.xlu0 %v2007_v5 }
 0x5bc   :  { %2018 = vrot.lane.b32.xlu0 %v9102_v25, %s8946_s5 }
 0x5c0   :  { %2477 = vrot.lane.b32.xlu0 %v9102_v25, %s8947_s6 }
 0x62f   :  { %v2009_v0 = vpop.xlane.xlu0 %2008 }
 0x630   :  { %v2010_v6 = vsub.f32 %v2006_v4, %v2009_v0 }
 0x632   :  { %v2011_v7 = vmul.f32 1.442695, %v2010_v6 }
 0x633   :  { %v2019_v8 = vpop.permute.xlu0 %2018 }
 0x634   :  { %8840 = vpow2.f32 %v2011_v7  ;;  %v2055_v9 = vand.u32 4294901760, %v2019_v8 }
 0x636   :  { %v2132_v10 = vsub.f32 %v2019_v8, %v2055_v9  ;;  %8423 = vmatpush3.msra.mxu0 %v2055_v9 }
 0x637   :  { %8432 = vmatprep.subr.mxu0 %v8940_v14  ;;  %v2478_v26 = vpop.permute.xlu0 %2477 }
 0x638   :  { %v2133_v11 = vand.u32 4294901760, %v2132_v10  ;;  %v2481_v29 = vsel %vm635_vm2, %v2478_v26, 0 }
 0x639   :  { %v2551_v32 = vand.u32 4294901760, %v2481_v29 }
 0x63a   :  { %v2134_v12 = vsub.f32 %v2132_v10, %v2133_v11 }
 0x63b   :  { %v2552_v36 = vsub.f32 %v2481_v29, %v2551_v32 }
 0x63c   :  { %v2135_v13 = vand.u32 4294901760, %v2134_v12 }
 0x63d   :  { %v2553_v39 = vand.u32 4294901760, %v2552_v36 }
 0x63e   :  { %8428 = vmatpush3.msra.mxu1 %v2135_v13 }
 0x63f   :  { %8437 = vmatprep.subr.mxu1 %v8940_v14  ;;  %v2554_v40 = vsub.f32 %v2552_v36, %v2553_v39 }
 0x641   :  { %v8841_v15 = vpop.eup %8840  ;;  %v2555_v41 = vand.u32 4294901760, %v2554_v40 }
 0x642   :  { %v2013_v16 = vsel %vm635_vm2, %v8841_v15, 0.0 }
 0x643   :  { %2014 = vadd.xlane.f32.xlu1 %v2013_v16 }
 0x654   :  { %2479 = vrot.lane.b32.xlu1 %v9102_v25, %s8948_s7 }
 0x6cc   :  { %v2015_v17 = vpop.xlane.xlu1 %2014 }
 0x6cd   :  { %8842 = vrcp.f32 %v2015_v17 }
 0x6d0   :  { %v2480_v18 = vpop.permute.xlu1 %2479 }
 0x6d1   :  { %v2483_v19 = vsel %vm635_vm2, %v2480_v18, 0 }
 0x6d2   :  { %v2516_v20 = vand.u32 4294901760, %v2483_v19 }
 0x6d4   :  { %v2593_v23 = vsub.f32 %v2483_v19, %v2516_v20 }
 0x6d6   :  { %v2594_v30 = vand.u32 4294901760, %v2593_v23 }
 0x6d8   :  { %v2595_v34 = vsub.f32 %v2593_v23, %v2594_v30 }
 0x6da   :  { %v8843_v21 = vpop.eup %8842  ;;  %v2596_v38 = vand.u32 4294901760, %v2595_v34 }
 0x6db   :  { %v2017_v24 = vmul.f32 %v8843_v21, %v8841_v15 }
 0x6dd   :  { %v2022_v27 = vsel %vm635_vm2, %v2017_v24, 0 }
 0x6de   :  { %v2090_v28 = vand.u32 4294901760, %v2022_v27 }
 0x6e0   :  { %v2091_v31 = vsub.f32 %v2022_v27, %v2090_v28  ;;  %8430 = vmatmul.mubr.f32.vlgmr.msra.gmra.mxu1 %v2090_v28 }
 0x6e1   :  { %8438 = vmatpush3.msra.mxu1 %v2055_v9  ;;  %8439 = vmatprep.mubr.msk.f32.mxu1 %vm8941_vm1, %v8940_v14 }
 0x6e2   :  { %8447 = vmatprep.subr.mxu1 %v8940_v14  ;;  %v2092_v33 = vand.u32 4294901760, %v2091_v31 }
 0x6e4   :  { %8440 = vmatmul.mubr.f32.vlgmr.msra.gmra.mxu1 %v2092_v33  ;;  %v2093_v35 = vsub.f32 %v2091_v31, %v2092_v33 }
 0x6e5   :  { %8448 = vmatpush3.msra.mxu1 %v2055_v9  ;;  %8449 = vmatprep.mubr.msk.f32.mxu1 %vm8941_vm1, %v8940_v14 }
 0x6e6   :  { %8457 = vmatprep.subr.mxu1 %v8940_v14  ;;  %v2094_v37 = vand.u32 4294901760, %v2093_v35 }
 0x6e8   :  { %8425 = vmatmul.mubr.f32.vlgmr.msra.gmra.mxu0 %v2094_v37  ;;  %8450 = vmatmul.mubr.f32.vlgmr.msra.gmra.mxu1 %v2090_v28 }
 0x6e9   :  { %8433 = vmatpush3.msra.mxu0 %v2132_v10  ;;  %8458 = vmatpush3.xpose.msra.mxu1 %v2596_v38 }
 0x6ea   :  { %8434 = vmatprep.mubr.msk.f32.mxu0 %vm8941_vm1, %v8940_v14  ;;  %8442 = vmatprep.subr.mxu0 %v8940_v14 }
 0x6eb   :  { %8459 = vmatprep.mubr.msk.f32.mxu1 %vm8941_vm1, %v8940_v14  ;;  %8467 = vmatprep.subr.mxu1 %v8940_v14 }
 0x6ec   :  { %8435 = vmatmul.mubr.f32.vlgmr.msra.gmra.mxu0 %v2091_v31  ;;  %8460 = vmatmul.mubr.f32.vlgmr.msra.gmra.mxu1 %v2551_v32 }
 0x6ed   :  { %8443 = vmatpush3.msra.mxu0 %v2133_v11  ;;  %8468 = vmatpush3.xpose.msra.mxu1 %v2516_v20 }
 0x6ee   :  { %8444 = vmatprep.mubr.msk.f32.mxu0 %vm8941_vm1, %v8940_v14  ;;  %8452 = vmatprep.subr.mxu0 %v8940_v14 }
 0x6ef   :  { %8469 = vmatprep.mubr.msk.f32.mxu1 %vm8941_vm1, %v8940_v14  ;;  %8477 = vmatprep.subr.mxu1 %v8940_v14 }
 0x6f0   :  { %8445 = vmatmul.mubr.f32.vlgmr.msra.gmra.mxu0 %v2090_v28  ;;  %8470 = vmatmul.mubr.f32.vlgmr.msra.gmra.mxu1 %v2553_v39 }
 0x6f1   :  { %8453 = vmatpush3.xpose.msra.mxu0 %v2516_v20  ;;  %8478 = vmatpush3.xpose.msra.mxu1 %v2516_v20 }
 0x6f2   :  { %8454 = vmatprep.mubr.msk.f32.mxu0 %vm8941_vm1, %v8940_v14  ;;  %8462 = vmatprep.subr.mxu0 %v8940_v14 }
 0x6f3   :  { %8479 = vmatprep.mubr.msk.f32.mxu1 %vm8941_vm1, %v8940_v14  ;;  %8487 = vmatprep.subr.mxu1 %v8940_v14 }
 0x6f4   :  { %8455 = vmatmul.mubr.f32.vlgmr.msra.gmra.mxu0 %v2555_v41  ;;  %8480 = vmatmul.mubr.f32.vlgmr.msra.gmra.mxu1 %v2551_v32 }
 0x6f5   :  { %8463 = vmatpush3.xpose.msra.mxu0 %v2593_v23  ;;  %8464 = vmatprep.mubr.msk.f32.mxu0 %vm8941_vm1, %v8940_v14 }
 0x6f6   :  { %8472 = vmatprep.subr.mxu0 %v8940_v14  ;;  %8489 = vmatprep.mubr.msk.f32.mxu1 %vm8941_vm1, %v8940_v14 }
 0x6f8   :  { %8465 = vmatmul.mubr.f32.vlgmr.msra.gmra.mxu0 %v2552_v36 }
 0x6f9   :  { %8473 = vmatpush3.xpose.msra.mxu0 %v2594_v30  ;;  %8474 = vmatprep.mubr.msk.f32.mxu0 %vm8941_vm1, %v8940_v14 }
 0x6fa   :  { %8482 = vmatprep.subr.mxu0 %v8940_v14 }
 0x6fc   :  { %8475 = vmatmul.mubr.f32.vlgmr.msra.gmra.mxu0 %v2551_v32 }
 0x6fd   :  { %8484 = vmatprep.mubr.msk.f32.mxu0 %vm8941_vm1, %v8940_v14 }
 0x7a0   :  { %v2172_v42 = vpop.f32.mrf.mxu1 }
 0x7a2   :  { %v8431_v43 = vpop.f32.mrf.mxu1 }
 0x7a4   :  { %v2320_v44 = vpop.f32.mrf.mxu1 }
 0x7a6   :  { %v8441_v45 = vpop.f32.mrf.mxu1 }
 0x7a8   :  { %v2096_v46 = vpop.f32.mrf.mxu0  ;;  %v2466_v47 = vpop.f32.mrf.mxu1 }
 0x7a9   :  { %v2173_v48 = vadd.f32 %v2172_v42, %v2096_v46 }
 0x7aa   :  { %v8426_v49 = vpop.f32.mrf.mxu0  ;;  %v8451_v50 = vpop.f32.mrf.mxu1 }
 0x7ac   :  { %v2246_v51 = vpop.f32.mrf.mxu0  ;;  %v2633_v52 = vpop.f32.mrf.mxu1 }
 0x7ad   :  { %v2247_v53 = vadd.f32 %v2246_v51, %v2173_v48 }
 0x7ae   :  { %v8436_v54 = vpop.f32.mrf.mxu0  ;;  %v8461_v55 = vpop.f32.mrf.mxu1 }
 0x7af   :  { %v2321_v56 = vadd.f32 %v2320_v44, %v2247_v53 }
 0x7b0   :  { %v2394_v57 = vpop.f32.mrf.mxu0  ;;  %v2781_v58 = vpop.f32.mrf.mxu1 }
 0x7b1   :  { %v2395_v59 = vadd.f32 %v2394_v57, %v2321_v56 }
 0x7b2   :  { %v8446_v60 = vpop.f32.mrf.mxu0  ;;  %v8471_v61 = vpop.f32.mrf.mxu1 }
 0x7b3   :  { %v9223_v62 = vadd.f32 %v2466_v47, %v2395_v59 }
 0x7b4   :  { %v2557_v63 = vpop.f32.mrf.mxu0  ;;  %v2927_v1 = vpop.f32.mrf.mxu1 }
 0x7b5   :  { %v2634_v4 = vadd.f32 %v2633_v52, %v2557_v63 }
 0x7b6   :  { %v8456_v2 = vpop.f32.mrf.mxu0  ;;  %v8481_v3 = vpop.f32.mrf.mxu1 }
 0x7b8   :  { %v2707_v5 = vpop.f32.mrf.mxu0 }
 0x7b9   :  { %v2708_v0 = vadd.f32 %v2707_v5, %v2634_v4 }
 0x7ba   :  { %v8466_v6 = vpop.f32.mrf.mxu0 }
 0x7bb   :  { %v2782_v7 = vadd.f32 %v2781_v58, %v2708_v0 }
 0x7bc   :  { %v2855_v8 = vpop.f32.mrf.mxu0 }
 0x7bd   :  { %v2856_v9 = vadd.f32 %v2855_v8, %v2782_v7 }
 0x7be   :  { %v8476_v10 = vpop.f32.mrf.mxu0 }
 0x7bf   :  { %v2928_v11 = vadd.f32 %v2927_v1, %v2856_v9 }
 0x7c1   :  { %v2931_v12 = vmul.f32 0.35355338, %v2928_v11 }
 0x7c3   :  { %v2932_v13 = vsel %vm635_vm2, %v2931_v12, -inf }
 0x7c4   :  { %2933 = vmax.xlane.f32.xlu1 %v2932_v13 }
 0x7d5   :  { %3404 = vrot.lane.b32.xlu1 %v9102_v25, %s8949_s8 }
 0x7d9   :  { %3402 = vrot.lane.b32.xlu1 %v9102_v25, %s8950_s9 }
 0x84d   :  { %v2934_v15 = vpop.xlane.xlu1 %2933 }
 0x84e   :  { %v2935_v16 = vsub.f32 %v2931_v12, %v2934_v15 }
 0x850   :  { %v2936_v17 = vmul.f32 1.442695, %v2935_v16 }
 0x851   :  { %v3405_v23 = vpop.permute.xlu1 %3404 }
 0x852   :  { %8844 = vpow2.f32 %v2936_v17  ;;  %v3408_v27 = vsel %vm635_vm2, %v3405_v23, 0 }
 0x853   :  { %v3441_v29 = vand.u32 4294901760, %v3408_v27 }
 0x855   :  { %v3518_v33 = vsub.f32 %v3408_v27, %v3441_v29  ;;  %v3403_v35 = vpop.permute.xlu1 %3402 }
 0x856   :  { %v3406_v39 = vsel %vm635_vm2, %v3403_v35, 0 }
 0x857   :  { %v3519_v38 = vand.u32 4294901760, %v3518_v33  ;;  %v3476_v41 = vand.u32 4294901760, %v3406_v39 }
 0x859   :  { %v3520_v43 = vsub.f32 %v3518_v33, %v3519_v38  ;;  %v3477_v45 = vsub.f32 %v3406_v39, %v3476_v41 }
 0x85b   :  { %v3521_v47 = vand.u32 4294901760, %v3520_v43  ;;  %v3478_v48 = vand.u32 4294901760, %v3477_v45 }
 0x85d   :  { %v3479_v49 = vsub.f32 %v3477_v45, %v3478_v48 }
 0x85f   :  { %v8845_v18 = vpop.eup %8844  ;;  %v3480_v50 = vand.u32 4294901760, %v3479_v49 }
 0x860   :  { %v2938_v19 = vsel %vm635_vm2, %v8845_v18, 0.0 }
 0x861   :  { %2939 = vadd.xlane.f32.xlu0 %v2938_v19 }
 0x877   :  { %2943 = vrot.lane.b32.xlu0 %v9102_v25, %s8951_s10 }
 0x8ea   :  { %v2940_v20 = vpop.xlane.xlu0 %2939 }
 0x8eb   :  { %8846 = vrcp.f32 %v2940_v20 }
 0x8ee   :  { %v2944_v21 = vpop.permute.xlu0 %2943 }
 0x8ef   :  { %v2980_v24 = vand.u32 4294901760, %v2944_v21 }
 0x8f1   :  { %v3057_v26 = vsub.f32 %v2944_v21, %v2980_v24  ;;  %8483 = vmatpush3.msra.mxu0 %v2980_v24 }
 0x8f2   :  { %8492 = vmatprep.subr.mxu0 %v8940_v14 }
 0x8f3   :  { %v3058_v28 = vand.u32 4294901760, %v3057_v26 }
 0x8f5   :  { %v3059_v30 = vsub.f32 %v3057_v26, %v3058_v28 }
 0x8f7   :  { %v3060_v31 = vand.u32 4294901760, %v3059_v30 }
 0x8f8   :  { %v8847_v32 = vpop.eup %8846 }
 0x8f9   :  { %8488 = vmatpush3.msra.mxu1 %v3060_v31  ;;  %v2942_v34 = vmul.f32 %v8847_v32, %v8845_v18 }
 0x8fa   :  { %8497 = vmatprep.subr.mxu1 %v8940_v14 }
 0x8fb   :  { %v2947_v36 = vsel %vm635_vm2, %v2942_v34, 0 }
 0x8fc   :  { %v3015_v37 = vand.u32 4294901760, %v2947_v36 }
 0x8fe   :  { %v3016_v40 = vsub.f32 %v2947_v36, %v3015_v37  ;;  %8490 = vmatmul.mubr.f32.vlgmr.msra.gmra.mxu1 %v3015_v37 }
 0x8ff   :  { %8498 = vmatpush3.msra.mxu1 %v2980_v24  ;;  %8499 = vmatprep.mubr.msk.f32.mxu1 %vm8941_vm1, %v8940_v14 }
 0x900   :  { %8507 = vmatprep.subr.mxu1 %v8940_v14  ;;  %v3017_v42 = vand.u32 4294901760, %v3016_v40 }
 0x902   :  { %8500 = vmatmul.mubr.f32.vlgmr.msra.gmra.mxu1 %v3017_v42  ;;  %v3018_v44 = vsub.f32 %v3016_v40, %v3017_v42 }
 0x903   :  { %8508 = vmatpush3.msra.mxu1 %v2980_v24  ;;  %8509 = vmatprep.mubr.msk.f32.mxu1 %vm8941_vm1, %v8940_v14 }
 0x904   :  { %8517 = vmatprep.subr.mxu1 %v8940_v14  ;;  %v3019_v46 = vand.u32 4294901760, %v3018_v44 }
 0x906   :  { %8485 = vmatmul.mubr.f32.vlgmr.msra.gmra.mxu0 %v3019_v46  ;;  %8510 = vmatmul.mubr.f32.vlgmr.msra.gmra.mxu1 %v3015_v37 }
 0x907   :  { %8493 = vmatpush3.msra.mxu0 %v3057_v26  ;;  %8518 = vmatpush3.xpose.msra.mxu1 %v3521_v47  ;;  %v4330_v47 = vsel %vm635_vm2, %v9100_v22, 0 }
 0x908   :  { %8494 = vmatprep.mubr.msk.f32.mxu0 %vm8941_vm1, %v8940_v14  ;;  %8502 = vmatprep.subr.mxu0 %v8940_v14 }
 0x909   :  { %8519 = vmatprep.mubr.msk.f32.mxu1 %vm8941_vm1, %v8940_v14  ;;  %8527 = vmatprep.subr.mxu1 %v8940_v14 }
 0x90a   :  { %8495 = vmatmul.mubr.f32.vlgmr.msra.gmra.mxu0 %v3016_v40  ;;  %8520 = vmatmul.mubr.f32.vlgmr.msra.gmra.mxu1 %v3476_v41 }
 0x90b   :  { %8503 = vmatpush3.msra.mxu0 %v3058_v28  ;;  %8528 = vmatpush3.xpose.msra.mxu1 %v3441_v29 }
 0x90c   :  { %8504 = vmatprep.mubr.msk.f32.mxu0 %vm8941_vm1, %v8940_v14  ;;  %8512 = vmatprep.subr.mxu0 %v8940_v14 }
 0x90d   :  { %8529 = vmatprep.mubr.msk.f32.mxu1 %vm8941_vm1, %v8940_v14  ;;  %8537 = vmatprep.subr.mxu1 %v8940_v14 }
 0x90e   :  { %8505 = vmatmul.mubr.f32.vlgmr.msra.gmra.mxu0 %v3015_v37  ;;  %8530 = vmatmul.mubr.f32.vlgmr.msra.gmra.mxu1 %v3478_v48 }
 0x90f   :  { %8513 = vmatpush3.xpose.msra.mxu0 %v3441_v29  ;;  %8538 = vmatpush3.xpose.msra.mxu1 %v3441_v29 }
 0x910   :  { %8514 = vmatprep.mubr.msk.f32.mxu0 %vm8941_vm1, %v8940_v14  ;;  %8522 = vmatprep.subr.mxu0 %v8940_v14 }
 0x911   :  { %8539 = vmatprep.mubr.msk.f32.mxu1 %vm8941_vm1, %v8940_v14  ;;  %8547 = vmatprep.subr.mxu1 %v8940_v14 }
 0x912   :  { %8515 = vmatmul.mubr.f32.vlgmr.msra.gmra.mxu0 %v3480_v50  ;;  %8540 = vmatmul.mubr.f32.vlgmr.msra.gmra.mxu1 %v3476_v41  ;;  %v4400_v50 = vand.u32 4294901760, %v4330_v47 }
 0x913   :  { %8523 = vmatpush3.xpose.msra.mxu0 %v3518_v33  ;;  %8524 = vmatprep.mubr.msk.f32.mxu0 %vm8941_vm1, %v8940_v14 }
 0x914   :  { %8532 = vmatprep.subr.mxu0 %v8940_v14  ;;  %8549 = vmatprep.mubr.msk.f32.mxu1 %vm8941_vm1, %v8940_v14 }
 0x916   :  { %8525 = vmatmul.mubr.f32.vlgmr.msra.gmra.mxu0 %v3477_v45 }
 0x917   :  { %8533 = vmatpush3.xpose.msra.mxu0 %v3519_v38  ;;  %8534 = vmatprep.mubr.msk.f32.mxu0 %vm8941_vm1, %v8940_v14 }
 0x918   :  { %8542 = vmatprep.subr.mxu0 %v8940_v14 }
 0x91a   :  { %8535 = vmatmul.mubr.f32.vlgmr.msra.gmra.mxu0 %v3476_v41 }
 0x91b   :  { %8544 = vmatprep.mubr.msk.f32.mxu0 %vm8941_vm1, %v8940_v14 }
 0x9be   :  { %v3097_v51 = vpop.f32.mrf.mxu1 }
 0x9c0   :  { %v8491_v52 = vpop.f32.mrf.mxu1 }
 0x9c2   :  { %v3245_v53 = vpop.f32.mrf.mxu1 }
 0x9c4   :  { %v8501_v54 = vpop.f32.mrf.mxu1 }
 0x9c5   :  { %v4401_v54 = vsub.f32 %v4330_v47, %v4400_v50 }
 0x9c6   :  { %v3021_v55 = vpop.f32.mrf.mxu0  ;;  %v3391_v56 = vpop.f32.mrf.mxu1 }
 0x9c7   :  { %v3098_v57 = vadd.f32 %v3097_v51, %v3021_v55 }
 0x9c8   :  { %v8486_v58 = vpop.f32.mrf.mxu0  ;;  %v8511_v59 = vpop.f32.mrf.mxu1 }
 0x9ca   :  { %v3171_v60 = vpop.f32.mrf.mxu0  ;;  %v3558_v61 = vpop.f32.mrf.mxu1 }
 0x9cb   :  { %v3172_v63 = vadd.f32 %v3171_v60, %v3098_v57 }
 0x9cc   :  { %v8496_v1 = vpop.f32.mrf.mxu0  ;;  %v8521_v2 = vpop.f32.mrf.mxu1 }
 0x9cd   :  { %v3246_v3 = vadd.f32 %v3245_v53, %v3172_v63 }
 0x9ce   :  { %v3319_v4 = vpop.f32.mrf.mxu0  ;;  %v3706_v5 = vpop.f32.mrf.mxu1 }
 0x9cf   :  { %v3320_v0 = vadd.f32 %v3319_v4, %v3246_v3 }
 0x9d0   :  { %v8506_v6 = vpop.f32.mrf.mxu0  ;;  %v8531_v7 = vpop.f32.mrf.mxu1 }
 0x9d1   :  { %v9272_v8 = vadd.f32 %v3391_v56, %v3320_v0  ;;  %v4402_v56 = vand.u32 4294901760, %v4401_v54 }
 0x9d2   :  { %v3482_v9 = vpop.f32.mrf.mxu0  ;;  %v3852_v10 = vpop.f32.mrf.mxu1 }
 0x9d3   :  { %v3559_v13 = vadd.f32 %v3558_v61, %v3482_v9  ;;  %v4403_v57 = vsub.f32 %v4401_v54, %v4402_v56 }
 0x9d4   :  { %v8516_v11 = vpop.f32.mrf.mxu0  ;;  %v8541_v12 = vpop.f32.mrf.mxu1 }
 0x9d5   :  { %v4404_v58 = vand.u32 4294901760, %v4403_v57 }
 0x9d6   :  { %v3632_v15 = vpop.f32.mrf.mxu0 }
 0x9d7   :  { %v3633_v16 = vadd.f32 %v3632_v15, %v3559_v13 }
 0x9d8   :  { %v8526_v17 = vpop.f32.mrf.mxu0 }
 0x9d9   :  { %v3707_v18 = vadd.f32 %v3706_v5, %v3633_v16 }
 0x9da   :  { %v3780_v19 = vpop.f32.mrf.mxu0 }
 0x9db   :  { %v3781_v20 = vadd.f32 %v3780_v19, %v3707_v18 }
 0x9dc   :  { %v8536_v21 = vpop.f32.mrf.mxu0 }
 0x9dd   :  { %v3853_v23 = vadd.f32 %v3852_v10, %v3781_v20 }
 0x9df   :  { %v3856_v24 = vmul.f32 0.35355338, %v3853_v23 }
 0x9e1   :  { %v3857_v26 = vsel %vm635_vm2, %v3856_v24, -inf }
 0x9e2   :  { %3858 = vmax.xlane.f32.xlu0 %v3857_v26 }
 0x9f8   :  { %3868 = vrot.lane.b32.xlu0 %v9102_v25, %s8952_s11 }
 0xa6b   :  { %v3859_v27 = vpop.xlane.xlu0 %3858 }
 0xa6c   :  { %v3860_v28 = vsub.f32 %v3856_v24, %v3859_v27 }
 0xa6e   :  { %v3861_v29 = vmul.f32 1.442695, %v3860_v28 }
 0xa6f   :  { %v3869_v30 = vpop.permute.xlu0 %3868 }
 0xa70   :  { %8848 = vpow2.f32 %v3861_v29  ;;  %v3905_v31 = vand.u32 4294901760, %v3869_v30 }
 0xa72   :  { %v3982_v32 = vsub.f32 %v3869_v30, %v3905_v31  ;;  %8543 = vmatpush3.msra.mxu0 %v3905_v31 }
 0xa73   :  { %8552 = vmatprep.subr.mxu0 %v8940_v14 }
 0xa74   :  { %v3983_v33 = vand.u32 4294901760, %v3982_v32 }
 0xa76   :  { %v3984_v34 = vsub.f32 %v3982_v32, %v3983_v33 }
 0xa78   :  { %v3985_v35 = vand.u32 4294901760, %v3984_v34 }
 0xa7a   :  { %8548 = vmatpush3.msra.mxu1 %v3985_v35 }
 0xa7b   :  { %8557 = vmatprep.subr.mxu1 %v8940_v14 }
 0xa7d   :  { %v8849_v36 = vpop.eup %8848 }
 0xa7e   :  { %v3863_v37 = vsel %vm635_vm2, %v8849_v36, 0.0 }
 0xa7f   :  { %3864 = vadd.xlane.f32.xlu1 %v3863_v37 }
 0xa90   :  { %4328 = vrot.lane.b32.xlu1 %v9100_v22, %s8942_s1 }
 0xb08   :  { %v3865_v25 = vpop.xlane.xlu1 %3864 }
 0xb09   :  { %8850 = vrcp.f32 %v3865_v25 }
 0xb0c   :  { %v4329_v38 = vpop.permute.xlu1 %4328 }
 0xb0d   :  { %v4332_v39 = vsel %vm635_vm2, %v4329_v38, 0 }
 0xb0e   :  { %v4365_v40 = vand.u32 4294901760, %v4332_v39 }
 0xb10   :  { %v4442_v42 = vsub.f32 %v4332_v39, %v4365_v40 }
 0xb12   :  { %v4443_v46 = vand.u32 4294901760, %v4442_v42 }
 0xb14   :  { %v4444_v51 = vsub.f32 %v4442_v42, %v4443_v46 }
 0xb16   :  { %v8851_v41 = vpop.eup %8850  ;;  %v4445_v55 = vand.u32 4294901760, %v4444_v51 }
 0xb17   :  { %v3867_v43 = vmul.f32 %v8851_v41, %v8849_v36 }
 0xb19   :  { %v3872_v44 = vsel %vm635_vm2, %v3867_v43, 0 }
 0xb1a   :  { %v3940_v45 = vand.u32 4294901760, %v3872_v44 }
 0xb1c   :  { %v3941_v48 = vsub.f32 %v3872_v44, %v3940_v45  ;;  %8550 = vmatmul.mubr.f32.vlgmr.msra.gmra.mxu1 %v3940_v45 }
 0xb1d   :  { %8558 = vmatpush3.msra.mxu1 %v3905_v31  ;;  %8559 = vmatprep.mubr.msk.f32.mxu1 %vm8941_vm1, %v8940_v14 }
 0xb1e   :  { %8567 = vmatprep.subr.mxu1 %v8940_v14  ;;  %v3942_v49 = vand.u32 4294901760, %v3941_v48 }
 0xb20   :  { %8560 = vmatmul.mubr.f32.vlgmr.msra.gmra.mxu1 %v3942_v49  ;;  %v3943_v52 = vsub.f32 %v3941_v48, %v3942_v49 }
 0xb21   :  { %8568 = vmatpush3.msra.mxu1 %v3905_v31  ;;  %8569 = vmatprep.mubr.msk.f32.mxu1 %vm8941_vm1, %v8940_v14 }
 0xb22   :  { %8577 = vmatprep.subr.mxu1 %v8940_v14  ;;  %v3944_v53 = vand.u32 4294901760, %v3943_v52 }
 0xb24   :  { %8545 = vmatmul.mubr.f32.vlgmr.msra.gmra.mxu0 %v3944_v53  ;;  %8570 = vmatmul.mubr.f32.vlgmr.msra.gmra.mxu1 %v3940_v45 }
 0xb25   :  { %8553 = vmatpush3.msra.mxu0 %v3982_v32  ;;  %8578 = vmatpush3.xpose.msra.mxu1 %v4445_v55 }
 0xb26   :  { %8554 = vmatprep.mubr.msk.f32.mxu0 %vm8941_vm1, %v8940_v14  ;;  %8562 = vmatprep.subr.mxu0 %v8940_v14 }
 0xb27   :  { %8579 = vmatprep.mubr.msk.f32.mxu1 %vm8941_vm1, %v8940_v14  ;;  %8587 = vmatprep.subr.mxu1 %v8940_v14 }
 0xb28   :  { %8555 = vmatmul.mubr.f32.vlgmr.msra.gmra.mxu0 %v3941_v48  ;;  %8580 = vmatmul.mubr.f32.vlgmr.msra.gmra.mxu1 %v4400_v50 }
 0xb29   :  { %8563 = vmatpush3.msra.mxu0 %v3983_v33  ;;  %8588 = vmatpush3.xpose.msra.mxu1 %v4365_v40 }
 0xb2a   :  { %8564 = vmatprep.mubr.msk.f32.mxu0 %vm8941_vm1, %v8940_v14  ;;  %8572 = vmatprep.subr.mxu0 %v8940_v14 }
 0xb2b   :  { %8589 = vmatprep.mubr.msk.f32.mxu1 %vm8941_vm1, %v8940_v14  ;;  %8597 = vmatprep.subr.mxu1 %v8940_v14 }
 0xb2c   :  { %8565 = vmatmul.mubr.f32.vlgmr.msra.gmra.mxu0 %v3940_v45  ;;  %8590 = vmatmul.mubr.f32.vlgmr.msra.gmra.mxu1 %v4402_v56 }
 0xb2d   :  { %8573 = vmatpush3.xpose.msra.mxu0 %v4365_v40  ;;  %8598 = vmatpush3.xpose.msra.mxu1 %v4365_v40 }
 0xb2e   :  { %8574 = vmatprep.mubr.msk.f32.mxu0 %vm8941_vm1, %v8940_v14  ;;  %8582 = vmatprep.subr.mxu0 %v8940_v14 }
 0xb2f   :  { %8599 = vmatprep.mubr.msk.f32.mxu1 %vm8941_vm1, %v8940_v14  ;;  %8607 = vmatprep.subr.mxu1 %v8940_v14 }
 0xb30   :  { %8575 = vmatmul.mubr.f32.vlgmr.msra.gmra.mxu0 %v4404_v58  ;;  %8600 = vmatmul.mubr.f32.vlgmr.msra.gmra.mxu1 %v4400_v50 }
 0xb31   :  { %8583 = vmatpush3.xpose.msra.mxu0 %v4442_v42  ;;  %8584 = vmatprep.mubr.msk.f32.mxu0 %vm8941_vm1, %v8940_v14 }
 0xb32   :  { %8592 = vmatprep.subr.mxu0 %v8940_v14  ;;  %8609 = vmatprep.mubr.msk.f32.mxu1 %vm8941_vm1, %v8940_v14 }
 0xb34   :  { %8585 = vmatmul.mubr.f32.vlgmr.msra.gmra.mxu0 %v4401_v54 }
 0xb35   :  { %8593 = vmatpush3.xpose.msra.mxu0 %v4443_v46  ;;  %8594 = vmatprep.mubr.msk.f32.mxu0 %vm8941_vm1, %v8940_v14 }
 0xb36   :  { %8602 = vmatprep.subr.mxu0 %v8940_v14 }
 0xb38   :  { %8595 = vmatmul.mubr.f32.vlgmr.msra.gmra.mxu0 %v4400_v50 }
 0xb39   :  { %8604 = vmatprep.mubr.msk.f32.mxu0 %vm8941_vm1, %v8940_v14 }
 0xbdc   :  { %v4022_v59 = vpop.f32.mrf.mxu1 }
 0xbde   :  { %v8551_v60 = vpop.f32.mrf.mxu1 }
 0xbe0   :  { %v4170_v61 = vpop.f32.mrf.mxu1 }
 0xbe2   :  { %v8561_v63 = vpop.f32.mrf.mxu1 }
 0xbe4   :  { %v3946_v1 = vpop.f32.mrf.mxu0  ;;  %v4316_v2 = vpop.f32.mrf.mxu1 }
 0xbe5   :  { %v4023_v3 = vadd.f32 %v4022_v59, %v3946_v1 }
 0xbe6   :  { %v8546_v4 = vpop.f32.mrf.mxu0  ;;  %v8571_v5 = vpop.f32.mrf.mxu1 }
 0xbe8   :  { %v4096_v0 = vpop.f32.mrf.mxu0  ;;  %v4482_v6 = vpop.f32.mrf.mxu1 }
 0xbe9   :  { %v4097_v7 = vadd.f32 %v4096_v0, %v4023_v3 }
 0xbea   :  { %v8556_v9 = vpop.f32.mrf.mxu0  ;;  %v8581_v10 = vpop.f32.mrf.mxu1 }
 0xbeb   :  { %v4171_v11 = vadd.f32 %v4170_v61, %v4097_v7 }
 0xbec   :  { %v4244_v12 = vpop.f32.mrf.mxu0  ;;  %v4630_v13 = vpop.f32.mrf.mxu1 }
 0xbed   :  { %v4245_v15 = vadd.f32 %v4244_v12, %v4171_v11 }
 0xbee   :  { %v8566_v16 = vpop.f32.mrf.mxu0  ;;  %v8591_v17 = vpop.f32.mrf.mxu1 }
 0xbef   :  { %v9320_v18 = vadd.f32 %v4316_v2, %v4245_v15 }
 0xbf0   :  { %v4406_v19 = vpop.f32.mrf.mxu0  ;;  %v4776_v20 = vpop.f32.mrf.mxu1 }
 0xbf1   :  { %v4483_v24 = vadd.f32 %v4482_v6, %v4406_v19 }
 0xbf2   :  { %v8576_v21 = vpop.f32.mrf.mxu0  ;;  %v8601_v23 = vpop.f32.mrf.mxu1 }
 0xbf4   :  { %v4556_v26 = vpop.f32.mrf.mxu0 }
 0xbf5   :  { %v4557_v27 = vadd.f32 %v4556_v26, %v4483_v24 }
 0xbf6   :  { %v8586_v28 = vpop.f32.mrf.mxu0 }
 0xbf7   :  { %v4631_v29 = vadd.f32 %v4630_v13, %v4557_v27 }
 0xbf8   :  { %v4704_v30 = vpop.f32.mrf.mxu0 }
 0xbf9   :  { %v4705_v31 = vadd.f32 %v4704_v30, %v4631_v29 }
 0xbfa   :  { %v8596_v32 = vpop.f32.mrf.mxu0 }
 0xbfb   :  { %v4777_v33 = vadd.f32 %v4776_v20, %v4705_v31 }
 0xbfd   :  { %v4780_v34 = vmul.f32 0.35355338, %v4777_v33 }
 0xbff   :  { %v4781_v35 = vsel %vm635_vm2, %v4780_v34, -inf }
 0xc00   :  { %4782 = vmax.xlane.f32.xlu0 %v4781_v35 }
 0xc16   :  { %4792 = vrot.lane.b32.xlu0 %v9100_v22, %s8944_s29 }
 0xc1a   :  { %5246 = vrot.lane.b32.xlu0 %v9100_v22, %s8945_s30 }
 0xc89   :  { %v4783_v36 = vpop.xlane.xlu0 %4782 }
 0xc8a   :  { %v4784_v37 = vsub.f32 %v4780_v34, %v4783_v36  ;;  %v9369_v34 = vld [vmem:[#allocation2 + $0x8] sm:$0xff] }
 0xc8c   :  { %v4785_v25 = vmul.f32 1.442695, %v4784_v37 }
 0xc8d   :  { %v4793_v38 = vpop.permute.xlu0 %4792 }
 0xc8e   :  { %8852 = vpow2.f32 %v4785_v25  ;;  %v4829_v39 = vand.u32 4294901760, %v4793_v38 }
 0xc90   :  { %v4906_v40 = vsub.f32 %v4793_v38, %v4829_v39  ;;  %8603 = vmatpush3.msra.mxu0 %v4829_v39 }
 0xc91   :  { %8612 = vmatprep.subr.mxu0 %v8940_v14  ;;  %v5247_v53 = vpop.permute.xlu0 %5246 }
 0xc92   :  { %v4907_v41 = vand.u32 4294901760, %v4906_v40  ;;  %v5250_v56 = vsel %vm635_vm2, %v5247_v53, 0 }
 0xc93   :  { %v5320_v59 = vand.u32 4294901760, %v5250_v56 }
 0xc94   :  { %v4908_v42 = vsub.f32 %v4906_v40, %v4907_v41 }
 0xc95   :  { %v5321_v1 = vsub.f32 %v5250_v56, %v5320_v59 }
 0xc96   :  { %v4909_v43 = vand.u32 4294901760, %v4908_v42 }
 0xc97   :  { %v5322_v4 = vand.u32 4294901760, %v5321_v1 }
 0xc98   :  { %8608 = vmatpush3.msra.mxu1 %v4909_v43 }
 0xc99   :  { %8617 = vmatprep.subr.mxu1 %v8940_v14  ;;  %v5323_v5 = vsub.f32 %v5321_v1, %v5322_v4 }
 0xc9b   :  { %v8853_v44 = vpop.eup %8852  ;;  %v5324_v0 = vand.u32 4294901760, %v5323_v5 }
 0xc9c   :  { %v4787_v45 = vsel %vm635_vm2, %v8853_v44, 0.0 }
 0xc9d   :  { %4788 = vadd.xlane.f32.xlu1 %v4787_v45 }
 0xcae   :  { %5248 = vrot.lane.b32.xlu1 %v9100_v22, %s8943_s2 }
 0xd26   :  { %v4789_v46 = vpop.xlane.xlu1 %4788 }
 0xd27   :  { %8854 = vrcp.f32 %v4789_v46 }
 0xd2a   :  { %v5249_v47 = vpop.permute.xlu1 %5248 }
 0xd2b   :  { %v5252_v48 = vsel %vm635_vm2, %v5249_v47, 0 }
 0xd2c   :  { %v5285_v49 = vand.u32 4294901760, %v5252_v48 }
 0xd2e   :  { %v5362_v51 = vsub.f32 %v5252_v48, %v5285_v49 }
 0xd30   :  { %v5363_v57 = vand.u32 4294901760, %v5362_v51 }
 0xd32   :  { %v5364_v61 = vsub.f32 %v5362_v51, %v5363_v57 }
 0xd34   :  { %v8855_v50 = vpop.eup %8854  ;;  %v5365_v3 = vand.u32 4294901760, %v5364_v61 }
 0xd35   :  { %v4791_v52 = vmul.f32 %v8855_v50, %v8853_v44 }
 0xd37   :  { %v4796_v54 = vsel %vm635_vm2, %v4791_v52, 0 }
 0xd38   :  { %v4864_v55 = vand.u32 4294901760, %v4796_v54 }
 0xd3a   :  { %v4865_v58 = vsub.f32 %v4796_v54, %v4864_v55  ;;  %8610 = vmatmul.mubr.f32.vlgmr.msra.gmra.mxu1 %v4864_v55 }
 0xd3b   :  { %8618 = vmatpush3.msra.mxu1 %v4829_v39  ;;  %8619 = vmatprep.mubr.msk.f32.mxu1 %vm8941_vm1, %v8940_v14 }
 0xd3c   :  { %8627 = vmatprep.subr.mxu1 %v8940_v14  ;;  %v4866_v60 = vand.u32 4294901760, %v4865_v58 }
 0xd3e   :  { %8620 = vmatmul.mubr.f32.vlgmr.msra.gmra.mxu1 %v4866_v60  ;;  %v4867_v63 = vsub.f32 %v4865_v58, %v4866_v60 }
 0xd3f   :  { %8628 = vmatpush3.msra.mxu1 %v4829_v39  ;;  %8629 = vmatprep.mubr.msk.f32.mxu1 %vm8941_vm1, %v8940_v14 }
 0xd40   :  { %8637 = vmatprep.subr.mxu1 %v8940_v14  ;;  %v4868_v2 = vand.u32 4294901760, %v4867_v63 }
 0xd42   :  { %8605 = vmatmul.mubr.f32.vlgmr.msra.gmra.mxu0 %v4868_v2  ;;  %8630 = vmatmul.mubr.f32.vlgmr.msra.gmra.mxu1 %v4864_v55 }
 0xd43   :  { %8613 = vmatpush3.msra.mxu0 %v4906_v40  ;;  %8638 = vmatpush3.xpose.msra.mxu1 %v5365_v3 }
 0xd44   :  { %8614 = vmatprep.mubr.msk.f32.mxu0 %vm8941_vm1, %v8940_v14  ;;  %8622 = vmatprep.subr.mxu0 %v8940_v14 }
 0xd45   :  { %8639 = vmatprep.mubr.msk.f32.mxu1 %vm8941_vm1, %v8940_v14  ;;  %8647 = vmatprep.subr.mxu1 %v8940_v14 }
 0xd46   :  { %8615 = vmatmul.mubr.f32.vlgmr.msra.gmra.mxu0 %v4865_v58  ;;  %8640 = vmatmul.mubr.f32.vlgmr.msra.gmra.mxu1 %v5320_v59 }
 0xd47   :  { %8623 = vmatpush3.msra.mxu0 %v4907_v41  ;;  %8648 = vmatpush3.xpose.msra.mxu1 %v5285_v49 }
 0xd48   :  { %8624 = vmatprep.mubr.msk.f32.mxu0 %vm8941_vm1, %v8940_v14  ;;  %8632 = vmatprep.subr.mxu0 %v8940_v14 }
 0xd49   :  { %8649 = vmatprep.mubr.msk.f32.mxu1 %vm8941_vm1, %v8940_v14  ;;  %8657 = vmatprep.subr.mxu1 %v8940_v14 }
 0xd4a   :  { %8625 = vmatmul.mubr.f32.vlgmr.msra.gmra.mxu0 %v4864_v55  ;;  %8650 = vmatmul.mubr.f32.vlgmr.msra.gmra.mxu1 %v5322_v4 }
 0xd4b   :  { %8633 = vmatpush3.xpose.msra.mxu0 %v5285_v49  ;;  %8658 = vmatpush3.xpose.msra.mxu1 %v5285_v49 }
 0xd4c   :  { %8634 = vmatprep.mubr.msk.f32.mxu0 %vm8941_vm1, %v8940_v14  ;;  %8642 = vmatprep.subr.mxu0 %v8940_v14 }
 0xd4d   :  { %8659 = vmatprep.mubr.msk.f32.mxu1 %vm8941_vm1, %v8940_v14  ;;  %8667 = vmatprep.subr.mxu1 %v8940_v14 }
 0xd4e   :  { %8635 = vmatmul.mubr.f32.vlgmr.msra.gmra.mxu0 %v5324_v0  ;;  %8660 = vmatmul.mubr.f32.vlgmr.msra.gmra.mxu1 %v5320_v59 }
 0xd4f   :  { %8643 = vmatpush3.xpose.msra.mxu0 %v5362_v51  ;;  %8644 = vmatprep.mubr.msk.f32.mxu0 %vm8941_vm1, %v8940_v14 }
 0xd50   :  { %8652 = vmatprep.subr.mxu0 %v8940_v14  ;;  %8669 = vmatprep.mubr.msk.f32.mxu1 %vm8941_vm1, %v8940_v14 }
 0xd52   :  { %8645 = vmatmul.mubr.f32.vlgmr.msra.gmra.mxu0 %v5321_v1 }
 0xd53   :  { %8653 = vmatpush3.xpose.msra.mxu0 %v5363_v57  ;;  %8654 = vmatprep.mubr.msk.f32.mxu0 %vm8941_vm1, %v8940_v14 }
 0xd54   :  { %8662 = vmatprep.subr.mxu0 %v8940_v14 }
 0xd56   :  { %8655 = vmatmul.mubr.f32.vlgmr.msra.gmra.mxu0 %v5320_v59 }
 0xd57   :  { %8664 = vmatprep.mubr.msk.f32.mxu0 %vm8941_vm1, %v8940_v14 }
 0xdfa   :  { %v4946_v6 = vpop.f32.mrf.mxu1 }
 0xdfc   :  { %v8611_v7 = vpop.f32.mrf.mxu1 }
 0xdfe   :  { %v5094_v9 = vpop.f32.mrf.mxu1 }
 0xe00   :  { %v8621_v10 = vpop.f32.mrf.mxu1 }
 0xe02   :  { %v4870_v11 = vpop.f32.mrf.mxu0  ;;  %v5240_v12 = vpop.f32.mrf.mxu1 }
 0xe03   :  { %v4947_v16 = vadd.f32 %v4946_v6, %v4870_v11 }
 0xe04   :  { %v8606_v13 = vpop.f32.mrf.mxu0  ;;  %v8631_v15 = vpop.f32.mrf.mxu1 }
 0xe06   :  { %v5020_v17 = vpop.f32.mrf.mxu0  ;;  %v5402_v19 = vpop.f32.mrf.mxu1 }
 0xe07   :  { %v5021_v20 = vadd.f32 %v5020_v17, %v4947_v16 }
 0xe08   :  { %v8616_v21 = vpop.f32.mrf.mxu0  ;;  %v8641_v23 = vpop.f32.mrf.mxu1 }
 0xe09   :  { %v5095_v24 = vadd.f32 %v5094_v9, %v5021_v20 }
 0xe0a   :  { %v5168_v26 = vpop.f32.mrf.mxu0  ;;  %v5550_v27 = vpop.f32.mrf.mxu1 }
 0xe0b   :  { %v5169_v28 = vadd.f32 %v5168_v26, %v5095_v24 }
 0xe0c   :  { %v8626_v29 = vpop.f32.mrf.mxu0  ;;  %v8651_v30 = vpop.f32.mrf.mxu1 }
 0xe0d   :  { %v5241_v31 = vadd.f32 %v5240_v12, %v5169_v28 }
 0xe0e   :  { %v5326_v32 = vpop.f32.mrf.mxu0  ;;  %v5696_v33 = vpop.f32.mrf.mxu1 }
 0xe0f   :  { %v5244_v35 = vadd.f32 %v9369_v34, %v5241_v31  ;;  %v5403_v25 = vadd.f32 %v5402_v19, %v5326_v32 }
 0xe10   :  { %v8636_v36 = vpop.f32.mrf.mxu0  ;;  %v8661_v37 = vpop.f32.mrf.mxu1 }
 0xe11   :  { %5245 = vst.msk [vmem:[#allocation7 + $0x8] sm:$0xff] %vm635_vm2, %v5244_v35 }
 0xe12   :  { %v5476_v38 = vpop.f32.mrf.mxu0 }
 0xe13   :  { %v5477_v39 = vadd.f32 %v5476_v38, %v5403_v25 }
 0xe14   :  { %v8646_v40 = vpop.f32.mrf.mxu0 }
 0xe15   :  { %v5551_v41 = vadd.f32 %v5550_v27, %v5477_v39 }
 0xe16   :  { %v5624_v42 = vpop.f32.mrf.mxu0 }
 0xe17   :  { %v5625_v43 = vadd.f32 %v5624_v42, %v5551_v41 }
 0xe18   :  { %v8656_v44 = vpop.f32.mrf.mxu0 }
 0xe19   :  { %v5697_v45 = vadd.f32 %v5696_v33, %v5625_v43 }
 0xe1b   :  { %v5700_v46 = vmul.f32 0.35355338, %v5697_v45 }
 0xe1d   :  { %v5701_v47 = vsel %vm635_vm2, %v5700_v46, -inf }
 0xe1e   :  { %5702 = vmax.xlane.f32.xlu1 %v5701_v47 }
 0xe2f   :  { %6172 = vrot.lane.b32.xlu1 %v9100_v22, %s8948_s7 }
 0xe33   :  { %6170 = vrot.lane.b32.xlu1 %v9100_v22, %s8947_s6 }
 0xea7   :  { %v5703_v48 = vpop.xlane.xlu1 %5702 }
 0xea8   :  { %v5704_v49 = vsub.f32 %v5700_v46, %v5703_v48 }
 0xeaa   :  { %v5705_v50 = vmul.f32 1.442695, %v5704_v49 }
 0xeab   :  { %v6173_v55 = vpop.permute.xlu1 %6172 }
 0xeac   :  { %8856 = vpow2.f32 %v5705_v50  ;;  %v6176_v58 = vsel %vm635_vm2, %v6173_v55, 0 }
 0xead   :  { %v6209_v60 = vand.u32 4294901760, %v6176_v58 }
 0xeaf   :  { %v6286_v2 = vsub.f32 %v6176_v58, %v6209_v60  ;;  %v6171_v4 = vpop.permute.xlu1 %6170 }
 0xeb0   :  { %v6174_v7 = vsel %vm635_vm2, %v6171_v4, 0 }
 0xeb1   :  { %v6287_v6 = vand.u32 4294901760, %v6286_v2  ;;  %v6244_v10 = vand.u32 4294901760, %v6174_v7 }
 0xeb3   :  { %v6288_v12 = vsub.f32 %v6286_v2, %v6287_v6  ;;  %v6245_v15 = vsub.f32 %v6174_v7, %v6244_v10 }
 0xeb5   :  { %v6289_v17 = vand.u32 4294901760, %v6288_v12  ;;  %v6246_v19 = vand.u32 4294901760, %v6245_v15 }
 0xeb7   :  { %v6247_v20 = vsub.f32 %v6245_v15, %v6246_v19 }
 0xeb9   :  { %v8857_v51 = vpop.eup %8856  ;;  %v6248_v21 = vand.u32 4294901760, %v6247_v20 }
 0xeba   :  { %v5707_v52 = vsel %vm635_vm2, %v8857_v51, 0.0 }
 0xebb   :  { %5708 = vadd.xlane.f32.xlu0 %v5707_v52 }
 0xed1   :  { %5712 = vrot.lane.b32.xlu0 %v9100_v22, %s8946_s5 }
 0xf44   :  { %v5709_v53 = vpop.xlane.xlu0 %5708 }
 0xf45   :  { %8858 = vrcp.f32 %v5709_v53 }
 0xf48   :  { %v5713_v54 = vpop.permute.xlu0 %5712 }
 0xf49   :  { %v5749_v56 = vand.u32 4294901760, %v5713_v54 }
 0xf4b   :  { %v5826_v57 = vsub.f32 %v5713_v54, %v5749_v56  ;;  %8663 = vmatpush3.msra.mxu0 %v5749_v56 }
 0xf4c   :  { %8672 = vmatprep.subr.mxu0 %v8940_v14 }
 0xf4d   :  { %v5827_v59 = vand.u32 4294901760, %v5826_v57 }
 0xf4f   :  { %v5828_v61 = vsub.f32 %v5826_v57, %v5827_v59 }
 0xf51   :  { %v5829_v63 = vand.u32 4294901760, %v5828_v61 }
 0xf52   :  { %v8859_v1 = vpop.eup %8858 }
 0xf53   :  { %8668 = vmatpush3.msra.mxu1 %v5829_v63  ;;  %v5711_v3 = vmul.f32 %v8859_v1, %v8857_v51 }
 0xf54   :  { %8677 = vmatprep.subr.mxu1 %v8940_v14 }
 0xf55   :  { %v5716_v5 = vsel %vm635_vm2, %v5711_v3, 0 }
 0xf56   :  { %v5784_v0 = vand.u32 4294901760, %v5716_v5 }
 0xf58   :  { %v5785_v9 = vsub.f32 %v5716_v5, %v5784_v0  ;;  %8670 = vmatmul.mubr.f32.vlgmr.msra.gmra.mxu1 %v5784_v0 }
 0xf59   :  { %8678 = vmatpush3.msra.mxu1 %v5749_v56  ;;  %8679 = vmatprep.mubr.msk.f32.mxu1 %vm8941_vm1, %v8940_v14 }
 0xf5a   :  { %8687 = vmatprep.subr.mxu1 %v8940_v14  ;;  %v5786_v11 = vand.u32 4294901760, %v5785_v9 }
 0xf5c   :  { %8680 = vmatmul.mubr.f32.vlgmr.msra.gmra.mxu1 %v5786_v11  ;;  %v5787_v13 = vsub.f32 %v5785_v9, %v5786_v11 }
 0xf5d   :  { %8688 = vmatpush3.msra.mxu1 %v5749_v56  ;;  %8689 = vmatprep.mubr.msk.f32.mxu1 %vm8941_vm1, %v8940_v14 }
 0xf5e   :  { %8697 = vmatprep.subr.mxu1 %v8940_v14  ;;  %v5788_v16 = vand.u32 4294901760, %v5787_v13 }
 0xf60   :  { %8665 = vmatmul.mubr.f32.vlgmr.msra.gmra.mxu0 %v5788_v16  ;;  %8690 = vmatmul.mubr.f32.vlgmr.msra.gmra.mxu1 %v5784_v0 }
 0xf61   :  { %8673 = vmatpush3.msra.mxu0 %v5826_v57  ;;  %8698 = vmatpush3.xpose.msra.mxu1 %v6289_v17 }
 0xf62   :  { %8674 = vmatprep.mubr.msk.f32.mxu0 %vm8941_vm1, %v8940_v14  ;;  %8682 = vmatprep.subr.mxu0 %v8940_v14 }
 0xf63   :  { %8699 = vmatprep.mubr.msk.f32.mxu1 %vm8941_vm1, %v8940_v14  ;;  %8707 = vmatprep.subr.mxu1 %v8940_v14 }
 0xf64   :  { %8675 = vmatmul.mubr.f32.vlgmr.msra.gmra.mxu0 %v5785_v9  ;;  %8700 = vmatmul.mubr.f32.vlgmr.msra.gmra.mxu1 %v6244_v10 }
 0xf65   :  { %8683 = vmatpush3.msra.mxu0 %v5827_v59  ;;  %8708 = vmatpush3.xpose.msra.mxu1 %v6209_v60 }
 0xf66   :  { %8684 = vmatprep.mubr.msk.f32.mxu0 %vm8941_vm1, %v8940_v14  ;;  %8692 = vmatprep.subr.mxu0 %v8940_v14 }
 0xf67   :  { %8709 = vmatprep.mubr.msk.f32.mxu1 %vm8941_vm1, %v8940_v14  ;;  %8717 = vmatprep.subr.mxu1 %v8940_v14 }
 0xf68   :  { %8685 = vmatmul.mubr.f32.vlgmr.msra.gmra.mxu0 %v5784_v0  ;;  %8710 = vmatmul.mubr.f32.vlgmr.msra.gmra.mxu1 %v6246_v19 }
 0xf69   :  { %8693 = vmatpush3.xpose.msra.mxu0 %v6209_v60  ;;  %8718 = vmatpush3.xpose.msra.mxu1 %v6209_v60 }
 0xf6a   :  { %8694 = vmatprep.mubr.msk.f32.mxu0 %vm8941_vm1, %v8940_v14  ;;  %8702 = vmatprep.subr.mxu0 %v8940_v14 }
 0xf6b   :  { %8719 = vmatprep.mubr.msk.f32.mxu1 %vm8941_vm1, %v8940_v14  ;;  %8727 = vmatprep.subr.mxu1 %v8940_v14 }
 0xf6c   :  { %8695 = vmatmul.mubr.f32.vlgmr.msra.gmra.mxu0 %v6248_v21  ;;  %8720 = vmatmul.mubr.f32.vlgmr.msra.gmra.mxu1 %v6244_v10 }
 0xf6d   :  { %8703 = vmatpush3.xpose.msra.mxu0 %v6286_v2  ;;  %8704 = vmatprep.mubr.msk.f32.mxu0 %vm8941_vm1, %v8940_v14 }
 0xf6e   :  { %8712 = vmatprep.subr.mxu0 %v8940_v14  ;;  %8729 = vmatprep.mubr.msk.f32.mxu1 %vm8941_vm1, %v8940_v14 }
 0xf70   :  { %8705 = vmatmul.mubr.f32.vlgmr.msra.gmra.mxu0 %v6245_v15 }
 0xf71   :  { %8713 = vmatpush3.xpose.msra.mxu0 %v6287_v6  ;;  %8714 = vmatprep.mubr.msk.f32.mxu0 %vm8941_vm1, %v8940_v14 }
 0xf72   :  { %8722 = vmatprep.subr.mxu0 %v8940_v14 }
 0xf74   :  { %8715 = vmatmul.mubr.f32.vlgmr.msra.gmra.mxu0 %v6244_v10 }
 0xf75   :  { %8724 = vmatprep.mubr.msk.f32.mxu0 %vm8941_vm1, %v8940_v14 }
0x1018   :  { %v5866_v23 = vpop.f32.mrf.mxu1 }
0x101a   :  { %v8671_v24 = vpop.f32.mrf.mxu1 }
0x101c   :  { %v6014_v26 = vpop.f32.mrf.mxu1 }
0x101e   :  { %v8681_v27 = vpop.f32.mrf.mxu1 }
0x1020   :  { %v5790_v28 = vpop.f32.mrf.mxu0  ;;  %v6160_v29 = vpop.f32.mrf.mxu1 }
0x1021   :  { %v5867_v30 = vadd.f32 %v5866_v23, %v5790_v28 }
0x1022   :  { %v8666_v31 = vpop.f32.mrf.mxu0  ;;  %v8691_v32 = vpop.f32.mrf.mxu1 }
0x1024   :  { %v5940_v33 = vpop.f32.mrf.mxu0  ;;  %v6326_v35 = vpop.f32.mrf.mxu1 }
0x1025   :  { %v5941_v36 = vadd.f32 %v5940_v33, %v5867_v30 }
0x1026   :  { %v8676_v37 = vpop.f32.mrf.mxu0  ;;  %v8701_v25 = vpop.f32.mrf.mxu1 }
0x1027   :  { %v6015_v38 = vadd.f32 %v6014_v26, %v5941_v36 }
0x1028   :  { %v6088_v39 = vpop.f32.mrf.mxu0  ;;  %v6474_v40 = vpop.f32.mrf.mxu1 }
0x1029   :  { %v6089_v41 = vadd.f32 %v6088_v39, %v6015_v38 }
0x102a   :  { %v8686_v42 = vpop.f32.mrf.mxu0  ;;  %v8711_v43 = vpop.f32.mrf.mxu1 }
0x102b   :  { %v9420_v44 = vadd.f32 %v6160_v29, %v6089_v41 }
0x102c   :  { %v6250_v45 = vpop.f32.mrf.mxu0  ;;  %v6620_v46 = vpop.f32.mrf.mxu1 }
0x102d   :  { %v6327_v49 = vadd.f32 %v6326_v35, %v6250_v45 }
0x102e   :  { %v8696_v47 = vpop.f32.mrf.mxu0  ;;  %v8721_v48 = vpop.f32.mrf.mxu1 }
0x1030   :  { %v6400_v50 = vpop.f32.mrf.mxu0 }
0x1031   :  { %v6401_v51 = vadd.f32 %v6400_v50, %v6327_v49 }
0x1032   :  { %v8706_v52 = vpop.f32.mrf.mxu0 }
0x1033   :  { %v6475_v53 = vadd.f32 %v6474_v40, %v6401_v51 }
0x1034   :  { %v6548_v54 = vpop.f32.mrf.mxu0 }
0x1035   :  { %v6549_v55 = vadd.f32 %v6548_v54, %v6475_v53 }
0x1036   :  { %v8716_v56 = vpop.f32.mrf.mxu0 }
0x1037   :  { %v6621_v57 = vadd.f32 %v6620_v46, %v6549_v55 }
0x1039   :  { %v6624_v58 = vmul.f32 0.35355338, %v6621_v57 }
0x103b   :  { %v6625_v59 = vsel %vm635_vm2, %v6624_v58, -inf }
0x103c   :  { %6626 = vmax.xlane.f32.xlu0 %v6625_v59 }
0x1052   :  { %6636 = vrot.lane.b32.xlu0 %v9100_v22, %s8951_s10 }
0x1056   :  { %7094 = vrot.lane.b32.xlu0 %v9100_v22, %s8950_s9 }
0x10c5   :  { %v6627_v60 = vpop.xlane.xlu0 %6626 }
0x10c6   :  { %v6628_v61 = vsub.f32 %v6624_v58, %v6627_v60 }
0x10c8   :  { %v6629_v63 = vmul.f32 1.442695, %v6628_v61 }
0x10c9   :  { %v6637_v1 = vpop.permute.xlu0 %6636 }
0x10ca   :  { %8860 = vpow2.f32 %v6629_v63  ;;  %v6673_v2 = vand.u32 4294901760, %v6637_v1 }
0x10cc   :  { %v6750_v3 = vsub.f32 %v6637_v1, %v6673_v2  ;;  %8723 = vmatpush3.msra.mxu0 %v6673_v2 }
0x10cd   :  { %8732 = vmatprep.subr.mxu0 %v8940_v14  ;;  %v7095_v17 = vpop.permute.xlu0 %7094 }
0x10ce   :  { %v6751_v4 = vand.u32 4294901760, %v6750_v3  ;;  %v7098_v21 = vsel %vm635_vm2, %v7095_v17, 0 }
0x10cf   :  { %v7168_v26 = vand.u32 4294901760, %v7098_v21 }
0x10d0   :  { %v6752_v5 = vsub.f32 %v6750_v3, %v6751_v4 }
0x10d1   :  { %v7169_v30 = vsub.f32 %v7098_v21, %v7168_v26 }
0x10d2   :  { %v6753_v0 = vand.u32 4294901760, %v6752_v5 }
0x10d3   :  { %v7170_v33 = vand.u32 4294901760, %v7169_v30 }
0x10d4   :  { %8728 = vmatpush3.msra.mxu1 %v6753_v0 }
0x10d5   :  { %8737 = vmatprep.subr.mxu1 %v8940_v14  ;;  %v7171_v35 = vsub.f32 %v7169_v30, %v7170_v33 }
0x10d7   :  { %v8861_v6 = vpop.eup %8860  ;;  %v7172_v36 = vand.u32 4294901760, %v7171_v35 }
0x10d8   :  { %v6631_v7 = vsel %vm635_vm2, %v8861_v6, 0.0 }
0x10d9   :  { %6632 = vadd.xlane.f32.xlu1 %v6631_v7 }
0x10ea   :  { %7096 = vrot.lane.b32.xlu1 %v9100_v22, %s8949_s8 }
0x1162   :  { %v6633_v9 = vpop.xlane.xlu1 %6632 }
0x1163   :  { %8862 = vrcp.f32 %v6633_v9 }
0x1166   :  { %v7097_v10 = vpop.permute.xlu1 %7096 }
0x1167   :  { %v7100_v11 = vsel %vm635_vm2, %v7097_v10, 0 }
0x1168   :  { %v7133_v12 = vand.u32 4294901760, %v7100_v11 }
0x116a   :  { %v7210_v15 = vsub.f32 %v7100_v11, %v7133_v12 }
0x116c   :  { %v7211_v23 = vand.u32 4294901760, %v7210_v15 }
0x116e   :  { %v7212_v28 = vsub.f32 %v7210_v15, %v7211_v23 }
0x1170   :  { %v8863_v13 = vpop.eup %8862  ;;  %v7213_v32 = vand.u32 4294901760, %v7212_v28 }
0x1171   :  { %v6635_v16 = vmul.f32 %v8863_v13, %v8861_v6 }
0x1173   :  { %v6640_v19 = vsel %vm635_vm2, %v6635_v16, 0  ;;  %v8869_v16 = vld [vmem:[#allocation2] sm:$0xff] }
0x1174   :  { %v6708_v20 = vand.u32 4294901760, %v6640_v19 }
0x1176   :  { %v6709_v24 = vsub.f32 %v6640_v19, %v6708_v20  ;;  %8730 = vmatmul.mubr.f32.vlgmr.msra.gmra.mxu1 %v6708_v20 }
0x1177   :  { %8738 = vmatpush3.msra.mxu1 %v6673_v2  ;;  %8739 = vmatprep.mubr.msk.f32.mxu1 %vm8941_vm1, %v8940_v14 }
0x1178   :  { %8747 = vmatprep.subr.mxu1 %v8940_v14  ;;  %v6710_v27 = vand.u32 4294901760, %v6709_v24 }
0x117a   :  { %8740 = vmatmul.mubr.f32.vlgmr.msra.gmra.mxu1 %v6710_v27  ;;  %v6711_v29 = vsub.f32 %v6709_v24, %v6710_v27 }
0x117b   :  { %8748 = vmatpush3.msra.mxu1 %v6673_v2  ;;  %8749 = vmatprep.mubr.msk.f32.mxu1 %vm8941_vm1, %v8940_v14 }
0x117c   :  { %8757 = vmatprep.subr.mxu1 %v8940_v14  ;;  %v6712_v31 = vand.u32 4294901760, %v6711_v29 }
0x117e   :  { %8725 = vmatmul.mubr.f32.vlgmr.msra.gmra.mxu0 %v6712_v31  ;;  %8750 = vmatmul.mubr.f32.vlgmr.msra.gmra.mxu1 %v6708_v20 }
0x117f   :  { %8733 = vmatpush3.msra.mxu0 %v6750_v3  ;;  %8758 = vmatpush3.xpose.msra.mxu1 %v7213_v32 }
0x1180   :  { %8734 = vmatprep.mubr.msk.f32.mxu0 %vm8941_vm1, %v8940_v14  ;;  %8742 = vmatprep.subr.mxu0 %v8940_v14 }
0x1181   :  { %8759 = vmatprep.mubr.msk.f32.mxu1 %vm8941_vm1, %v8940_v14  ;;  %8767 = vmatprep.subr.mxu1 %v8940_v14 }
0x1182   :  { %8735 = vmatmul.mubr.f32.vlgmr.msra.gmra.mxu0 %v6709_v24  ;;  %8760 = vmatmul.mubr.f32.vlgmr.msra.gmra.mxu1 %v7168_v26 }
0x1183   :  { %8743 = vmatpush3.msra.mxu0 %v6751_v4  ;;  %8768 = vmatpush3.xpose.msra.mxu1 %v7133_v12 }
0x1184   :  { %8744 = vmatprep.mubr.msk.f32.mxu0 %vm8941_vm1, %v8940_v14  ;;  %8752 = vmatprep.subr.mxu0 %v8940_v14 }
0x1185   :  { %8769 = vmatprep.mubr.msk.f32.mxu1 %vm8941_vm1, %v8940_v14  ;;  %8777 = vmatprep.subr.mxu1 %v8940_v14 }
0x1186   :  { %8745 = vmatmul.mubr.f32.vlgmr.msra.gmra.mxu0 %v6708_v20  ;;  %8770 = vmatmul.mubr.f32.vlgmr.msra.gmra.mxu1 %v7170_v33 }
0x1187   :  { %8753 = vmatpush3.xpose.msra.mxu0 %v7133_v12  ;;  %8778 = vmatpush3.xpose.msra.mxu1 %v7133_v12 }
0x1188   :  { %8754 = vmatprep.mubr.msk.f32.mxu0 %vm8941_vm1, %v8940_v14  ;;  %8762 = vmatprep.subr.mxu0 %v8940_v14 }
0x1189   :  { %8779 = vmatprep.mubr.msk.f32.mxu1 %vm8941_vm1, %v8940_v14  ;;  %8787 = vmatprep.subr.mxu1 %v8940_v14 }
0x118a   :  { %8755 = vmatmul.mubr.f32.vlgmr.msra.gmra.mxu0 %v7172_v36  ;;  %8780 = vmatmul.mubr.f32.vlgmr.msra.gmra.mxu1 %v7168_v26 }
0x118b   :  { %8763 = vmatpush3.xpose.msra.mxu0 %v7210_v15  ;;  %8764 = vmatprep.mubr.msk.f32.mxu0 %vm8941_vm1, %v8940_v14 }
0x118c   :  { %8772 = vmatprep.subr.mxu0 %v8940_v14  ;;  %8789 = vmatprep.mubr.msk.f32.mxu1 %vm8941_vm1, %v8940_v14 }
0x118e   :  { %8765 = vmatmul.mubr.f32.vlgmr.msra.gmra.mxu0 %v7169_v30 }
0x118f   :  { %8773 = vmatpush3.xpose.msra.mxu0 %v7211_v23  ;;  %8774 = vmatprep.mubr.msk.f32.mxu0 %vm8941_vm1, %v8940_v14 }
0x1190   :  { %8782 = vmatprep.subr.mxu0 %v8940_v14 }
0x1192   :  { %8775 = vmatmul.mubr.f32.vlgmr.msra.gmra.mxu0 %v7168_v26 }
0x1193   :  { %8784 = vmatprep.mubr.msk.f32.mxu0 %vm8941_vm1, %v8940_v14 }
0x1236   :  { %v6790_v37 = vpop.f32.mrf.mxu1 }
0x1238   :  { %v8731_v25 = vpop.f32.mrf.mxu1 }
0x123a   :  { %v6938_v38 = vpop.f32.mrf.mxu1 }
0x123c   :  { %v8741_v39 = vpop.f32.mrf.mxu1 }
0x123e   :  { %v6714_v40 = vpop.f32.mrf.mxu0  ;;  %v7084_v41 = vpop.f32.mrf.mxu1 }
0x123f   :  { %v6791_v0 = vadd.f32 %v6790_v37, %v6714_v40 }
0x1240   :  { %v8726_v42 = vpop.f32.mrf.mxu0  ;;  %v8751_v43 = vpop.f32.mrf.mxu1 }
0x1242   :  { %v6864_v45 = vpop.f32.mrf.mxu0  ;;  %v7250_v46 = vpop.f32.mrf.mxu1 }
0x1243   :  { %v6865_v6 = vadd.f32 %v6864_v45, %v6791_v0 }
0x1244   :  { %v8736_v47 = vpop.f32.mrf.mxu0  ;;  %v8761_v48 = vpop.f32.mrf.mxu1 }
0x1245   :  { %v6939_v7 = vadd.f32 %v6938_v38, %v6865_v6 }
0x1246   :  { %v7012_v49 = vpop.f32.mrf.mxu0  ;;  %v7398_v50 = vpop.f32.mrf.mxu1 }
0x1247   :  { %v7013_v9 = vadd.f32 %v7012_v49, %v6939_v7 }
0x1248   :  { %v8746_v51 = vpop.f32.mrf.mxu0  ;;  %v8771_v52 = vpop.f32.mrf.mxu1 }
0x1249   :  { %v7085_v10 = vadd.f32 %v7084_v41, %v7013_v9 }
0x124a   :  { %v7174_v53 = vpop.f32.mrf.mxu0  ;;  %v7544_v54 = vpop.f32.mrf.mxu1 }
0x124b   :  { %v7251_v57 = vadd.f32 %v7250_v46, %v7174_v53 }
0x124c   :  { %v8756_v55 = vpop.f32.mrf.mxu0  ;;  %v8781_v56 = vpop.f32.mrf.mxu1 }
0x124e   :  { %v7324_v58 = vpop.f32.mrf.mxu0 }
0x124f   :  { %v7325_v59 = vadd.f32 %v7324_v58, %v7251_v57 }
0x1250   :  { %v8766_v60 = vpop.f32.mrf.mxu0 }
0x1251   :  { %v7399_v61 = vadd.f32 %v7398_v50, %v7325_v59 }
0x1252   :  { %v7472_v63 = vpop.f32.mrf.mxu0 }
0x1253   :  { %v7473_v1 = vadd.f32 %v7472_v63, %v7399_v61 }
0x1254   :  { %v8776_v2 = vpop.f32.mrf.mxu0 }
0x1255   :  { %v7545_v3 = vadd.f32 %v7544_v54, %v7473_v1 }
0x1257   :  { %v7548_v4 = vmul.f32 0.35355338, %v7545_v3 }
0x1259   :  { %v7549_v5 = vsel %vm635_vm2, %v7548_v4, -inf }
0x125a   :  { %7550 = vmax.xlane.f32.xlu1 %v7549_v5 }
0x126b   :  { %2471 = vrot.lane.b32.xlu1 %v9223_v62, %s8938_s19 }
0x126f   :  { %6165 = vrot.lane.b32.xlu1 %v9420_v44, %s8938_s19 }
0x1273   :  { %7089 = vrot.lane.b32.xlu1 %v7085_v10, %s8953_s12 }
0x12e3   :  { %v7551_v11 = vpop.xlane.xlu1 %7550 }
0x12e4   :  { %v7552_v12 = vsub.f32 %v7548_v4, %v7551_v11 }
0x12e6   :  { %v7553_v13 = vmul.f32 1.442695, %v7552_v12 }
0x12e7   :  { %v2472_v15 = vpop.permute.xlu1 %2471 }
0x12e8   :  { %8864 = vpow2.f32 %v7553_v13  ;;  %v2474_v17 = vadd.f32 %v8869_v16, %v2472_v15 }
0x12ea   :  { %2476 = vst.msk [vmem:[#allocation7] sm:$0xff] %vm2475_vm3, %v2474_v17 }
0x12eb   :  { %v6166_v19 = vpop.permute.xlu1 %6165 }
0x12ec   :  { %v6168_v20 = vadd.f32 %v9369_v34, %v6166_v19 }
0x12ee   :  { %6169 = vst.msk [vmem:[#allocation7 + $0x8] sm:$0xff] %vm2475_vm3, %v6168_v20 }
0x12ef   :  { %v7090_v62 = vpop.permute.xlu1 %7089 }
0x12f0   :  { %v7092_v44 = vadd.f32 %v9369_v34, %v7090_v62 }
0x12f2   :  { %7093 = vst.msk [vmem:[#allocation7 + $0x8] sm:$0xff] %vm3400_vm4, %v7092_v44 }
0x12f5   :  { %v8865_v21 = vpop.eup %8864 }
0x12f6   :  { %v7555_v23 = vsel %vm635_vm2, %v8865_v21, 0.0 }
0x12f7   :  { %7556 = vadd.xlane.f32.xlu0 %v7555_v23 }
0x130d   :  { %7560 = vrot.lane.b32.xlu0 %v9100_v22, %s8952_s11 }
0x1311   :  { %3396 = vrot.lane.b32.xlu0 %v9272_v8, %s8953_s12 }
0x1315   :  { %4321 = vrot.lane.b32.xlu0 %v9320_v18, %s8954_s13 }
0x1380   :  { %v7557_v24 = vpop.xlane.xlu0 %7556 }
0x1381   :  { %8866 = vrcp.f32 %v7557_v24 }
0x1384   :  { %v7561_v26 = vpop.permute.xlu0 %7560 }
0x1385   :  { %v7597_v27 = vand.u32 4294901760, %v7561_v26 }
0x1387   :  { %v7674_v28 = vsub.f32 %v7561_v26, %v7597_v27  ;;  %8783 = vmatpush3.msra.mxu0 %v7597_v27 }
0x1388   :  { %v3397_v29 = vpop.permute.xlu0 %3396  ;;  %8792 = vmatprep.subr.mxu0 %v8940_v14 }
0x1389   :  { %v7675_v30 = vand.u32 4294901760, %v7674_v28  ;;  %v3399_v31 = vadd.f32 %v8869_v16, %v3397_v29 }
0x138b   :  { %v7676_v32 = vsub.f32 %v7674_v28, %v7675_v30  ;;  %3401 = vst.msk [vmem:[#allocation7] sm:$0xff] %vm3400_vm4, %v3399_v31 }
0x138c   :  { %v4322_v22 = vpop.permute.xlu0 %4321 }
0x138d   :  { %v7677_v8 = vand.u32 4294901760, %v7676_v32  ;;  %v4324_v33 = vadd.f32 %v8869_v16, %v4322_v22 }
0x138e   :  { %v8867_v35 = vpop.eup %8866 }
0x138f   :  { %8788 = vmatpush3.msra.mxu1 %v7677_v8  ;;  %v7559_v18 = vmul.f32 %v8867_v35, %v8865_v21  ;;  %4326 = vst.msk [vmem:[#allocation7] sm:$0xff] %vm4325_vm5, %v4324_v33 }
0x1390   :  { %8797 = vmatprep.subr.mxu1 %v8940_v14 }
0x1391   :  { %v7564_v36 = vsel %vm635_vm2, %v7559_v18, 0 }
0x1392   :  { %v7632_v37 = vand.u32 4294901760, %v7564_v36 }
0x1394   :  { %v7633_v25 = vsub.f32 %v7564_v36, %v7632_v37  ;;  %8790 = vmatmul.mubr.f32.vlgmr.msra.gmra.mxu1 %v7632_v37 }
0x1395   :  { %8798 = vmatpush3.msra.mxu1 %v7597_v27  ;;  %8799 = vmatprep.mubr.msk.f32.mxu1 %vm8941_vm1, %v8940_v14 }
0x1396   :  { %8807 = vmatprep.subr.mxu1 %v8940_v14  ;;  %v7634_v38 = vand.u32 4294901760, %v7633_v25 }
0x1398   :  { %8800 = vmatmul.mubr.f32.vlgmr.msra.gmra.mxu1 %v7634_v38  ;;  %v7635_v39 = vsub.f32 %v7633_v25, %v7634_v38 }
0x1399   :  { %8808 = vmatpush3.msra.mxu1 %v7597_v27  ;;  %8809 = vmatprep.mubr.msk.f32.mxu1 %vm8941_vm1, %v8940_v14 }
0x139a   :  { %v7636_v40 = vand.u32 4294901760, %v7635_v39 }
0x139c   :  { %8785 = vmatmul.mubr.f32.vlgmr.msra.gmra.mxu0 %v7636_v40  ;;  %8810 = vmatmul.mubr.f32.vlgmr.msra.gmra.mxu1 %v7632_v37 }
0x139d   :  { %8793 = vmatpush3.msra.mxu0 %v7674_v28  ;;  %8794 = vmatprep.mubr.msk.f32.mxu0 %vm8941_vm1, %v8940_v14 }
0x139e   :  { %8802 = vmatprep.subr.mxu0 %v8940_v14 }
0x13a0   :  { %8795 = vmatmul.mubr.f32.vlgmr.msra.gmra.mxu0 %v7633_v25 }
0x13a1   :  { %8803 = vmatpush3.msra.mxu0 %v7675_v30  ;;  %8804 = vmatprep.mubr.msk.f32.mxu0 %vm8941_vm1, %v8940_v14 }
0x13a4   :  { %8805 = vmatmul.mubr.f32.vlgmr.msra.gmra.mxu0 %v7632_v37 }
0x1454   :  { %v7714_v41 = vpop.f32.mrf.mxu1 }
0x1456   :  { %v8791_v42 = vpop.f32.mrf.mxu1 }
0x1458   :  { %v7862_v43 = vpop.f32.mrf.mxu1 }
0x145a   :  { %v8801_v45 = vpop.f32.mrf.mxu1 }
0x145c   :  { %v7638_v46 = vpop.f32.mrf.mxu0  ;;  %v8008_v47 = vpop.f32.mrf.mxu1 }
0x145d   :  { %v7715_v50 = vadd.f32 %v7714_v41, %v7638_v46 }
0x145e   :  { %v8786_v48 = vpop.f32.mrf.mxu0  ;;  %v8811_v49 = vpop.f32.mrf.mxu1 }
0x1460   :  { %v7788_v51 = vpop.f32.mrf.mxu0 }
0x1461   :  { %v7789_v52 = vadd.f32 %v7788_v51, %v7715_v50 }
0x1462   :  { %v8796_v53 = vpop.f32.mrf.mxu0 }
0x1463   :  { %v7863_v54 = vadd.f32 %v7862_v43, %v7789_v52 }
0x1464   :  { %v7936_v55 = vpop.f32.mrf.mxu0 }
0x1465   :  { %v7937_v56 = vadd.f32 %v7936_v55, %v7863_v54 }
0x1466   :  { %v8806_v57 = vpop.f32.mrf.mxu0 }
0x1467   :  { %v8009_v58 = vadd.f32 %v8008_v47, %v7937_v56 }
0x1469   :  { %8013 = vrot.lane.b32.xlu1 %v8009_v58, %s8954_s13 }
0x14db   :  { %v8014_v14 = vpop.permute.xlu1 %8013 }
0x14dc   :  { %v8016_v59 = vadd.f32 %v9369_v34, %v8014_v14 }
0x14de   :  { %8017 = vst.msk [vmem:[#allocation7 + $0x8] sm:$0xff] %vm4325_vm5, %v8016_v59 }
0x14df   :  { %8921 = shalt.err (!%p8918_p0)
}
0x14e0   :  { %8029 = dma.vmem_to_hbm [thread:$0]  %s8024_s15, 256, %s9511_s4, [#allocation4], %s8937_s18, %s8937_s18, %s8938_s19  }
0x14e1   :  { %8934 = dma.done.wait [#allocation4], 256  }
0x14e2   :  { %8935 = vsyncadd [#allocation4], 4294967040 }
0x14e3   :  { %8033 = vsyncpa [#allocation3], 1 }
0x14e4   :  { %8034 = vsyncpa [#allocation6], 1 }
0x14e5   :  { %8035 = vsyncpa [#allocation4], 1 }

</bundles_post_ra>
